<compile_context>
chip_gen: v7x
topology: tpu7x:2x2x1
jax: 0.10.0
libtpu: 0.0.40
codegen_flags: <defaults>
</compile_context>

<pallas_src>
import math
import jax
import jax.numpy as jnp
from jax.experimental import pallas as pl
from jax.experimental.pallas import tpu as pltpu

MLP_SCALE = 4

_MiB = 1024 * 1024


def _round_up(x, m):
    return ((x + m - 1) // m) * m


# ---------------------------------------------------------------------------
# Generation-aware hardware policy (v5e/v6e: 128 MiB VMEM, v7x: 64 MiB / TC).
# ---------------------------------------------------------------------------
def _vmem_capacity_bytes():
    try:
        cap = int(getattr(pltpu.get_tpu_info(), "vmem_capacity_bytes", 0) or 0)
        if cap > 0:
            return cap
    except Exception:
        pass
    return 64 * _MiB  # conservative fallback: assume v7x per-TC VMEM


def _num_tensorcores():
    """Best-effort TensorCore count (v5e/v6e: 1, v7x: 2)."""
    try:
        info = pltpu.get_tpu_info()
        for name in ("num_cores", "core_count", "num_tensorcores", "cores"):
            v = getattr(info, name, None)
            if isinstance(v, int) and v > 0:
                return v
    except Exception:
        pass
    try:
        kind = jax.devices()[0].device_kind.lower()
        if "v7" in kind:
            return 2
    except Exception:
        pass
    return 1


def _vmem_policy():
    cap = _vmem_capacity_bytes()
    budget = cap * 3 // 4                            # tile-sizing budget (~75%)
    limit = min(cap - 4 * _MiB, budget + 8 * _MiB)   # compiler cap, < physical
    limit = max(limit, budget)
    return budget, limit


# ---------------------------------------------------------------------------
# Tile selection.
# ---------------------------------------------------------------------------
def _vmem_need_bytes(tm, th, C):
    io = 2 * tm * C * (4 + 4 + 4)                  # x/attn/out windows, f32, 2x buffered
    wts = 2 * (C * th * 2 + th * 4 + th * C * 2)   # W1/b1/W2 windows, 2x buffered
    inter = tm * th * (4 + 2) + tm * C * (2 + 4)   # h(f32), g(bf16), x(bf16), dot partial
    return io + wts + inter


def _tm_candidates(M, num_cores):
    cap = M
    if num_cores >= 2 and M > 8:
        # Only multi-TC chips (v7x) benefit from >= num_cores steps on the
        # "parallel" M axis; on single-TC chips the cap would just add a
        # pipeline step and shrink the MXU M fill.
        cap = min(cap, _round_up(pl.cdiv(M, num_cores), 8))
    cands = [t for t in (512, 384, 256, 128, 64, 32, 16, 8) if t <= cap]
    if cap not in cands and (cap == M or cap % 8 == 0):
        cands.insert(0, cap)
    if not cands:
        cands = [M]            # tiny M: a full-extent block is always legal
    return cands


def _th_candidates(H):
    # th must be lane-aligned (multiple of 128) and divide H exactly so no
    # garbage columns ever enter the c_proj contraction; H itself (full
    # extent) is always legal.
    cands = [H]
    t = (H // 128) * 128
    while t >= 128:
        if t < H and H % t == 0:
            cands.append(t)
        t -= 128
    return cands


def _select_tiles(M, C, H, budget, num_cores):
    # Largest row tile first (measured 29%/63%/85% of HBM roofline at
    # tm=128/256/512; 256-multiples also fill the 256-wide MXU M dim on
    # v6e/v7x), then the largest H tile that fits the VMEM budget
    # (th == H keeps both weight matrices resident; smaller th streams them
    # over an "arbitrary" grid axis, which is what keeps tm large on v7x).
    for tm in _tm_candidates(M, num_cores):
        for th in _th_candidates(H):
            if _vmem_need_bytes(tm, th, C) <= budget:
                return tm, th
    return _tm_candidates(M, num_cores)[-1], _th_candidates(H)[-1]


# ---------------------------------------------------------------------------
# Kernel.
# ---------------------------------------------------------------------------
def _mlp_gate_kernel(x_ref, attn_ref, w1_ref, b1_ref, w2_ref, o_ref):
    k = pl.program_id(1)

    @pl.when(k == 0)
    def _():
        # The f32 output tile doubles as the c_proj accumulator: its block
        # index only depends on the M grid index, so it stays resident in
        # VMEM across the H axis (equivalent to a (tm, C) f32 scratch, minus
        # the extra buffer and final copy).
        o_ref[...] = jnp.zeros_like(o_ref)

    # c_fc slice: bf16 operands on the MXU, f32 accumulation.  x arrives f32
    # straight from HBM and is cast here (cheap VPU work overlapping the MXU)
    # so the wrapper never materializes a standalone bf16 copy.
    xb = x_ref[...].astype(jnp.bfloat16)
    h = jnp.dot(xb, w1_ref[...], preferred_element_type=jnp.float32) + b1_ref[...]

    # GELU (tanh approximation, matches nn.GELU(approximate='tanh')) in f32;
    # tanh runs on the EUP, the rest on the VPU, overlapping MXU work.
    # TODO(synk): at small C on v5e this elementwise chain (not the matmuls)
    # can become the binding unit; only then is a cheaper approximation worth it.
    c0 = 0.7978845608028654            # sqrt(2/pi)
    c1 = 0.044715 * c0                 # fold the outer constant into the cubic
    g = 0.5 * h * (1.0 + jnp.tanh(h * (c0 + c1 * (h * h))))

    # c_proj slice (no bias), accumulated over the H grid axis.
    o_ref[...] += jnp.dot(g.astype(jnp.bfloat16), w2_ref[...],
                          preferred_element_type=jnp.float32)

    @pl.when(k == pl.num_programs(1) - 1)
    def _():
        # Elementwise gating with `attn` (the residual `res` in Block.forward).
        o_ref[...] = o_ref[...] * attn_ref[...]


def mlp_gate(program, attn, w1, b1, w2):
    """program, attn: (B, T, C) f32.  Returns (B, T, C) f32 = MLP(program) * attn."""
    B, T, C = program.shape
    H = w1.shape[1]
    M = B * T

    budget, vmem_limit = _vmem_policy()
    tm, th = _select_tiles(M, C, H, budget, _num_tensorcores())
    grid_m = pl.cdiv(M, tm)
    grid_h = pl.cdiv(H, th)

    # No wrapper-side pad / bf16 convert of the activations: a ragged last M
    # tile is handled by Pallas (OOB input rows are unspecified but fully
    # row-independent through both matmuls; OOB output rows are dropped on
    # writeback).  Only the weights are pre-cast for the MXU.
    x2 = program.reshape(M, C)
    a2 = attn.reshape(M, C).astype(jnp.float32)
    w1b = w1.astype(jnp.bfloat16)
    w2b = w2.astype(jnp.bfloat16)
    b1_2d = b1.reshape(1, H).astype(jnp.float32)
    # TODO(synk): on v7x, fp8(e4m3) weights would halve weight VMEM/DMA and
    # raise MXU throughput; omitted pending an accuracy gate.

    weight_bytes = C * H * 2 + H * 4 + H * C * 2
    act_bytes = 3 * M * C * 4
    cost = pl.CostEstimate(
        flops=4 * M * C * H,
        transcendentals=M * H,
        bytes_accessed=int(act_bytes + weight_bytes * (grid_m if grid_h > 1 else 1)),
    )

    grid_spec = pltpu.PrefetchScalarGridSpec(
        num_scalar_prefetch=0,
        grid=(grid_m, grid_h),
        in_specs=[
            pl.BlockSpec((tm, C), lambda i, k: (i, 0)),   # x rows (f32)
            pl.BlockSpec((tm, C), lambda i, k: (i, 0)),   # attn rows (f32)
            pl.BlockSpec((C, th), lambda i, k: (0, k)),   # W1 column block (bf16)
            pl.BlockSpec((1, th), lambda i, k: (0, k)),   # b1 block (f32)
            pl.BlockSpec((th, C), lambda i, k: (k, 0)),   # W2 row block (bf16)
        ],
        out_specs=pl.BlockSpec((tm, C), lambda i, k: (i, 0)),
    )

    out = pl.pallas_call(
        _mlp_gate_kernel,
        out_shape=jax.ShapeDtypeStruct((M, C), jnp.float32),
        grid_spec=grid_spec,
        compiler_params=pltpu.CompilerParams(
            dimension_semantics=("parallel", "arbitrary"),
            vmem_limit_bytes=int(vmem_limit),
        ),
        cost_estimate=cost,
    )(x2, a2, w1b, b1_2d, w2b)

    return out.reshape(B, T, C)


# ---------------------------------------------------------------------------
# References.
# ---------------------------------------------------------------------------
def reference_f32(program, attn, w1, b1, w2):
    """Pure-f32 reference (matches the PyTorch module's math)."""
    h = program @ w1 + b1
    g = 0.5 * h * (1.0 + jnp.tanh(0.7978845608028654 * (h + 0.044715 * h ** 3)))
    return (g @ w2) * attn


def reference_mixed(program, attn, w1, b1, w2):
    """Mirrors the kernel's mixed precision: bf16 MXU operands, f32 accum/GELU."""
    x = program.astype(jnp.bfloat16)
    h = jnp.dot(x, w1.astype(jnp.bfloat16),
                preferred_element_type=jnp.float32) + b1
    g = 0.5 * h * (1.0 + jnp.tanh(0.7978845608028654 * (h + 0.044715 * h ** 3)))
    y = jnp.dot(g.astype(jnp.bfloat16), w2.astype(jnp.bfloat16),
                preferred_element_type=jnp.float32)
    return y * attn


if __name__ == "__main__":
    # Small GPT-style block: n_embd = 128 (lane-dense channel dim),
    # hidden = MLP_SCALE * n_embd = 512.
    B, T, C = 2, 64, 128
    H = MLP_SCALE * C

    key = jax.random.PRNGKey(0)
    k_prog, k_attn, k_w1, k_b1, k_w2 = jax.random.split(key, 5)

    program = jax.random.normal(k_prog, (B, T, C), dtype=jnp.float32)
    attn = jax.random.normal(k_attn, (B, T, C), dtype=jnp.float32)

    # PyTorch nn.Linear default init: U(-1/sqrt(fan_in), 1/sqrt(fan_in)).
    w1 = jax.random.uniform(k_w1, (C, H), jnp.float32,
                            -1.0 / math.sqrt(C), 1.0 / math.sqrt(C))
    b1 = jax.random.uniform(k_b1, (H,), jnp.float32,
                            -1.0 / math.sqrt(C), 1.0 / math.sqrt(C))
    w2 = jax.random.uniform(k_w2, (H, C), jnp.float32,
                            -1.0 / math.sqrt(H), 1.0 / math.sqrt(H))

    out = jax.block_until_ready(mlp_gate(program, attn, w1, b1, w2))
    assert out.shape == (B, T, C)

    ref_mixed = reference_mixed(program, attn, w1, b1, w2)
    ref_f32 = reference_f32(program, attn, w1, b1, w2)
    assert jnp.allclose(out, ref_mixed, atol=2e-3, rtol=2e-3), \
        "mismatch vs mixed-precision reference"
    assert jnp.allclose(out, ref_f32, atol=5e-2, rtol=5e-2), \
        "mismatch vs f32 reference"

    print("KERNEL_OK")
</pallas_src>

<mosaic_0001>
module attributes {stable_mosaic.version = 11 : i64} {
  func.func @_mlp_gate_kernel(%arg0: i32, %arg1: i32, %arg2: memref<128x128xf32, #tpu.memory_space<vmem>>, %arg3: memref<128x128xf32, #tpu.memory_space<vmem>>, %arg4: memref<128x512xbf16, #tpu.memory_space<vmem>>, %arg5: memref<1x512xf32, #tpu.memory_space<vmem>>, %arg6: memref<512x128xbf16, #tpu.memory_space<vmem>>, %arg7: memref<128x128xf32, #tpu.memory_space<vmem>>) attributes {dimension_semantics = [#tpu.dimension_semantics<parallel>, #tpu.dimension_semantics<arbitrary>], iteration_bounds = array<i64: 1, 1>, scalar_prefetch = 0 : i64, scratch_operands = 0 : i64, tpu.core_type = #tpu.core_type<tc>, window_params = [{transform_indices = @transform_0, window_bounds = array<i64: 128, 128>}, {transform_indices = @transform_1, window_bounds = array<i64: 128, 128>}, {transform_indices = @transform_2, window_bounds = array<i64: 128, 512>}, {transform_indices = @transform_3, window_bounds = array<i64: 1, 512>}, {transform_indices = @transform_4, window_bounds = array<i64: 512, 128>}, {transform_indices = @transform_5, window_bounds = array<i64: 128, 128>}]} {
    %c0_i32 = arith.constant 0 : i32
    %0 = arith.cmpi eq, %arg1, %c0_i32 : i32
    %1 = arith.extui %0 : i1 to i32
    %c0_i32_0 = arith.constant 0 : i32
    %2 = arith.cmpi ne, %1, %c0_i32_0 : i32
    scf.if %2 {
      %cst_19 = arith.constant 0.000000e+00 : f32
      %31 = vector.broadcast %cst_19 : f32 to vector<128x128xf32>
      %c0_20 = arith.constant 0 : index
      %c0_21 = arith.constant 0 : index
      %32 = vector.load %arg7[%c0_20, %c0_21] : memref<128x128xf32, #tpu.memory_space<vmem>>, vector<128x128xf32>
      tpu.vector_store %arg7[%c0_20, %c0_21], %31 {strides = array<i32>} : memref<128x128xf32, #tpu.memory_space<vmem>>, vector<128x128xf32>,
    } else {
    }
    %c0 = arith.constant 0 : index
    %c0_1 = arith.constant 0 : index
    %3 = vector.load %arg2[%c0, %c0_1] : memref<128x128xf32, #tpu.memory_space<vmem>>, vector<128x128xf32>
    %4 = arith.truncf %3 : vector<128x128xf32> to vector<128x128xbf16>
    %c0_2 = arith.constant 0 : index
    %c0_3 = arith.constant 0 : index
    %5 = vector.load %arg4[%c0_2, %c0_3] : memref<128x512xbf16, #tpu.memory_space<vmem>>, vector<128x512xbf16>
    %cst = arith.constant dense<0.000000e+00> : vector<128x512xf32>
    %6 = tpu.matmul %4, %5, %cst {dimension_numbers = #tpu.dot_dimension_numbers<[1], [0], [0], [1], [0, 0, 1, 1], [], []>} : vector<128x128xbf16>, vector<128x512xbf16>, vector<128x512xf32> -> vector<128x512xf32>
    %c0_4 = arith.constant 0 : index
    %c0_5 = arith.constant 0 : index
    %7 = vector.load %arg5[%c0_4, %c0_5] : memref<1x512xf32, #tpu.memory_space<vmem>>, vector<1x512xf32>
    %8 = vector.broadcast %7 : vector<1x512xf32> to vector<128x512xf32>
    %9 = arith.addf %6, %8 : vector<128x512xf32>
    %cst_6 = arith.constant 5.000000e-01 : f32
    %10 = vector.broadcast %cst_6 : f32 to vector<128x512xf32>
    %11 = arith.mulf %10, %9 : vector<128x512xf32>
    %12 = arith.mulf %9, %9 : vector<128x512xf32>
    %cst_7 = arith.constant 0.0356774069 : f32
    %13 = vector.broadcast %cst_7 : f32 to vector<128x512xf32>
    %14 = arith.mulf %13, %12 : vector<128x512xf32>
    %cst_8 = arith.constant 0.797884583 : f32
    %15 = vector.broadcast %cst_8 : f32 to vector<128x512xf32>
    %16 = arith.addf %15, %14 : vector<128x512xf32>
    %17 = arith.mulf %9, %16 : vector<128x512xf32>
    %18 = math.tanh %17 : vector<128x512xf32>
    %cst_9 = arith.constant 1.000000e+00 : f32
    %19 = vector.broadcast %cst_9 : f32 to vector<128x512xf32>
    %20 = arith.addf %19, %18 : vector<128x512xf32>
    %21 = arith.mulf %11, %20 : vector<128x512xf32>
    %c0_10 = arith.constant 0 : index
    %c0_11 = arith.constant 0 : index
    %22 = vector.load %arg7[%c0_10, %c0_11] : memref<128x128xf32, #tpu.memory_space<vmem>>, vector<128x128xf32>
    %23 = arith.truncf %21 : vector<128x512xf32> to vector<128x512xbf16>
    %c0_12 = arith.constant 0 : index
    %c0_13 = arith.constant 0 : index
    %24 = vector.load %arg6[%c0_12, %c0_13] : memref<512x128xbf16, #tpu.memory_space<vmem>>, vector<512x128xbf16>
    %cst_14 = arith.constant dense<0.000000e+00> : vector<128x128xf32>
    %25 = tpu.matmul %23, %24, %cst_14 {dimension_numbers = #tpu.dot_dimension_numbers<[1], [0], [0], [1], [0, 0, 1, 1], [], []>} : vector<128x512xbf16>, vector<512x128xbf16>, vector<128x128xf32> -> vector<128x128xf32>
    %26 = arith.addf %22, %25 : vector<128x128xf32>
    %c0_15 = arith.constant 0 : index
    %c0_16 = arith.constant 0 : index
    %27 = vector.load %arg7[%c0_15, %c0_16] : memref<128x128xf32, #tpu.memory_space<vmem>>, vector<128x128xf32>
    tpu.vector_store %arg7[%c0_15, %c0_16], %26 {strides = array<i32>} : memref<128x128xf32, #tpu.memory_space<vmem>>, vector<128x128xf32>,
    %c0_i32_17 = arith.constant 0 : i32
    %28 = arith.cmpi eq, %arg1, %c0_i32_17 : i32
    %29 = arith.extui %28 : i1 to i32
    %c0_i32_18 = arith.constant 0 : i32
    %30 = arith.cmpi ne, %29, %c0_i32_18 : i32
    scf.if %30 {
      %c0_19 = arith.constant 0 : index
      %c0_20 = arith.constant 0 : index
      %31 = vector.load %arg7[%c0_19, %c0_20] : memref<128x128xf32, #tpu.memory_space<vmem>>, vector<128x128xf32>
      %c0_21 = arith.constant 0 : index
      %c0_22 = arith.constant 0 : index
      %32 = vector.load %arg3[%c0_21, %c0_22] : memref<128x128xf32, #tpu.memory_space<vmem>>, vector<128x128xf32>
      %33 = arith.mulf %31, %32 : vector<128x128xf32>
      %c0_23 = arith.constant 0 : index
      %c0_24 = arith.constant 0 : index
      %34 = vector.load %arg7[%c0_23, %c0_24] : memref<128x128xf32, #tpu.memory_space<vmem>>, vector<128x128xf32>
      tpu.vector_store %arg7[%c0_23, %c0_24], %33 {strides = array<i32>} : memref<128x128xf32, #tpu.memory_space<vmem>>, vector<128x128xf32>,
    } else {
    }
    return
  }
  func.func @transform_0(%arg0: i32, %arg1: i32) -> (i32, i32) {
    %c0_i32 = arith.constant 0 : i32
    %c0_i32_0 = arith.constant 0 : i32
    return %arg0, %c0_i32 : i32, i32
  }
  func.func @transform_1(%arg0: i32, %arg1: i32) -> (i32, i32) {
    %c0_i32 = arith.constant 0 : i32
    %c0_i32_0 = arith.constant 0 : i32
    return %arg0, %c0_i32 : i32, i32
  }
  func.func @transform_2(%arg0: i32, %arg1: i32) -> (i32, i32) {
    %c0_i32 = arith.constant 0 : i32
    %c0_i32_0 = arith.constant 0 : i32
    return %c0_i32, %arg1 : i32, i32
  }
  func.func @transform_3(%arg0: i32, %arg1: i32) -> (i32, i32) {
    %c0_i32 = arith.constant 0 : i32
    %c0_i32_0 = arith.constant 0 : i32
    return %c0_i32, %arg1 : i32, i32
  }
  func.func @transform_4(%arg0: i32, %arg1: i32) -> (i32, i32) {
    %c0_i32 = arith.constant 0 : i32
    %c0_i32_0 = arith.constant 0 : i32
    return %arg1, %c0_i32 : i32, i32
  }
  func.func @transform_5(%arg0: i32, %arg1: i32) -> (i32, i32) {
    %c0_i32 = arith.constant 0 : i32
    %c0_i32_0 = arith.constant 0 : i32
    return %arg0, %c0_i32 : i32, i32
  }
}

</mosaic_0001>

<bundles_post_ra>
// kernel: tpu_custom_call.1
= control target key start
LH: loop header
LB: loop body
LE: loop exit
PB: predicated region body
PF: predicated region fallthrough
CT: control target
= control target key end

     0   :  { %10 = vsyncpa [#allocation3], 0  ;;  %s2951_s0 = inlined_call_operand.hbm [shape: f32[128,128], index: 0, kind: input, shape index: {}]   ;;  %s2952_s1 = inlined_call_operand.hbm [shape: f32[128,128], index: 1, kind: input, shape index: {}]   ;;  %s2953_s2 = inlined_call_operand.hbm [shape: bf16[128,512], index: 2, kind: input, shape index: {}]   ;;  %s2954_s3 = inlined_call_operand.vmem [shape: f32[1,512], index: 3, kind: input, shape index: {}]   ;;  %s2955_s4 = inlined_call_operand.hbm [shape: bf16[512,128], index: 4, kind: input, shape index: {}]   ;;  %s2956_s5 = inlined_call_operand.hbm [shape: f32[128,128], index: 5, kind: output, shape index: {}]  }
   0x1   :  { %11 = vsyncpa [#allocation6], 0 }
   0x2   :  { %12 = vsyncpa [#allocation9], 0 }
   0x3   :  { %13 = vsyncpa [#allocation4], 0  ;;  %s2220_s18 = smov [#allocation5]   ;;  %s2221_s20 = smov [#allocation2]  }
   0x4   :  { %s31_s19 = sshll.u32 %s2220_s18, 4  ;;  %s19_s21 = sshll.u32 %s2221_s20, 4  ;;  %s32_s19 = int_to_ptr.vmem [resolvable:$true] %s31_s19  ;;  %s2262_s21 = int_to_ptr.vmem [resolvable:$true] %s19_s21 }
   0x5   :  { %s2102_s24 = scalar_lea.hbm %s2952_s1, 2048 }
   0x6   :  { %p2103_p0 = scmp.ne.s32.totalorder %s2952_s1, %s2102_s24  ;;  %p2106_p1 = scmp.lt.u32.totalorder %s2102_s24, %s2952_s1 }
   0x8   :  { %p2108_p2 = pnand %p2106_p1, %p2103_p0 }
   0xa   :  { %2111 = shalt.err (!%p2108_p2)
}
   0xb   :  { %s2112_s29 = scalar_lea.vmem %s32_s19, 2048  ;;  %p2117_p4 = scmp.lt.s32.totalorder %s32_s19, %s32_s19 }
   0xc   :  { %p2113_p3 = scmp.ne.s32.totalorder %s32_s19, %s2112_s29  ;;  %p2118_p5 = scmp.lt.s32.totalorder %s2112_s29, %s2112_s29 }
   0xe   :  { %p2119_p6 = por %p2118_p5, %p2117_p4 }
  0x10   :  { %p2120_p7 = pnand %p2119_p6, %p2113_p3 }
  0x12   :  { %2123 = shalt.err (!%p2120_p7)
}
  0x13   :  { %s2222_s30 = smov 128   ;;  %s2223_s6 = smov 8  }
  0x14   :  { %37 = dma.hbm_to_vmem [thread:$0]  %s2952_s1, 2048, %s32_s19, [#allocation6], %s2222_s30, %s2222_s30, %s2223_s6  }
  0x15   :  { %s2124_s11 = scalar_lea.hbm %s2951_s0, 2048 }
  0x16   :  { %p2125_p8 = scmp.ne.s32.totalorder %s2951_s0, %s2124_s11  ;;  %p2128_p9 = scmp.lt.u32.totalorder %s2124_s11, %s2951_s0 }
  0x18   :  { %p2130_p10 = pnand %p2128_p9, %p2125_p8 }
  0x1a   :  { %2133 = shalt.err (!%p2130_p10)
}
  0x1b   :  { %s2134_s16 = scalar_lea.vmem %s2262_s21, 2048  ;;  %p2139_p12 = scmp.lt.s32.totalorder %s2262_s21, %s2262_s21 }
  0x1c   :  { %p2135_p11 = scmp.ne.s32.totalorder %s2262_s21, %s2134_s16  ;;  %p2140_p13 = scmp.lt.s32.totalorder %s2134_s16, %s2134_s16 }
  0x1e   :  { %p2141_p0 = por %p2140_p13, %p2139_p12 }
  0x20   :  { %p2142_p1 = pnand %p2141_p0, %p2135_p11 }
  0x22   :  { %2145 = shalt.err (!%p2142_p1)
}
  0x23   :  { %25 = dma.hbm_to_vmem [thread:$0]  %s2951_s0, 2048, %s2262_s21, [#allocation3], %s2222_s30, %s2222_s30, %s2223_s6  }
  0x24   :  { %s2224_s18 = smov [#allocation7]   ;;  %s2146_s23 = scalar_lea.hbm %s2953_s2, 4096 }
  0x25   :  { %s43_s19 = sshll.u32 %s2224_s18, 4  ;;  %p2147_p2 = scmp.ne.s32.totalorder %s2953_s2, %s2146_s23  ;;  %s44_s19 = int_to_ptr.vmem [resolvable:$true] %s43_s19 }
  0x26   :  { %p2150_p3 = scmp.lt.u32.totalorder %s2146_s23, %s2953_s2 }
  0x28   :  { %p2152_p4 = pnand %p2150_p3, %p2147_p2 }
  0x2a   :  { %2155 = shalt.err (!%p2152_p4)
}
  0x2b   :  { %s2156_s28 = scalar_lea.vmem %s44_s19, 4096  ;;  %p2161_p6 = scmp.lt.s32.totalorder %s44_s19, %s44_s19 }
  0x2c   :  { %p2157_p5 = scmp.ne.s32.totalorder %s44_s19, %s2156_s28  ;;  %p2162_p7 = scmp.lt.s32.totalorder %s2156_s28, %s2156_s28 }
  0x2e   :  { %p2163_p8 = por %p2162_p7, %p2161_p6 }
  0x30   :  { %p2164_p9 = pnand %p2163_p8, %p2157_p5 }
  0x32   :  { %2167 = shalt.err (!%p2164_p9)
}
  0x33   :  { %s2225_s0 = smov 256   ;;  %s2226_s21 = smov 16  }
  0x34   :  { %49 = dma.hbm_to_vmem [thread:$0]  %s2953_s2, 4096, %s44_s19, [#allocation6], %s2225_s0, %s2225_s0, %s2226_s21  }
  0x35   :  { %s2227_s8 = smov [#allocation8]   ;;  %s2168_s12 = scalar_lea.hbm %s2955_s4, 4096 }
  0x36   :  { %s57_s9 = sshll.u32 %s2227_s8, 4  ;;  %p2169_p10 = scmp.ne.s32.totalorder %s2955_s4, %s2168_s12  ;;  %s58_s9 = int_to_ptr.vmem [resolvable:$true] %s57_s9 }
  0x37   :  { %p2172_p11 = scmp.lt.u32.totalorder %s2168_s12, %s2955_s4 }
  0x39   :  { %p2174_p12 = pnand %p2172_p11, %p2169_p10 }
  0x3b   :  { %2177 = shalt.err (!%p2174_p12)
}
  0x3c   :  { %s2178_s1 = scalar_lea.vmem %s58_s9, 4096  ;;  %p2183_p0 = scmp.lt.s32.totalorder %s58_s9, %s58_s9 }
  0x3d   :  { %p2179_p13 = scmp.ne.s32.totalorder %s58_s9, %s2178_s1  ;;  %p2184_p1 = scmp.lt.s32.totalorder %s2178_s1, %s2178_s1 }
  0x3f   :  { %p2185_p2 = por %p2184_p1, %p2183_p0 }
  0x41   :  { %p2186_p3 = pnand %p2185_p2, %p2179_p13 }
  0x43   :  { %2189 = shalt.err (!%p2186_p3)
}
  0x44   :  { %s2228_s2 = smov 64   ;;  %s2229_s17 = smov 4  }
  0x45   :  { %63 = dma.hbm_to_vmem [thread:$0]  %s2955_s4, 4096, %s58_s9, [#allocation9], %s2228_s2, %s2228_s2, %s2229_s17  }
  0x46   :  { %2212 = dma.done.wait [#allocation3], 2048  }
  0x47   :  { %2213 = vsyncadd [#allocation3], 4294965248 }
  0x48   :  { %2214 = dma.done.wait [#allocation6], 6144  }
  0x49   :  { %2215 = vsyncadd [#allocation6], 4294961152 }
  0x4a   :  { %2216 = dma.done.wait [#allocation9], 4096  }
  0x4b   :  { %2217 = vsyncadd [#allocation9], 4294963200  ;;  %v2230_v0 = vmov 0   ;;  %v1894_v1 = vld [vmem:[#allocation7 + $0x4] ss:$16 sps:$4 sm:$0xff]   ;;  %v98_v34 = vld [vmem:[#allocation2 + $0x8] sm:$0xff] }
  0x4c   :  { %367 = vmatprep.mubr.bf16.mxu0 %v2230_v0  ;;  %480 = vmatprep.mubr.bf16.mxu1 %v2230_v0  ;;  %v1896_v2 = vld [vmem:[#allocation7 + $0xc] ss:$16 sps:$4 sm:$0xff]   ;;  %v1898_v3 = vld [vmem:[#allocation7] ss:$16 sps:$4 sm:$0xff]   ;;  %v1899_v4 = vld [vmem:[#allocation7 + $0x8] ss:$16 sps:$4 sm:$0xff]  }
  0x4d   :  { %335 = vmatprep.subr.bf16.mxu0 %v1894_v1  ;;  %448 = vmatprep.subr.bf16.mxu1 %v1896_v2  ;;  %v1900_v5 = vld [vmem:[#allocation7 + $0x24] ss:$16 sps:$4 sm:$0xff]   ;;  %v1902_v6 = vld [vmem:[#allocation7 + $0x2c] ss:$16 sps:$4 sm:$0xff]   ;;  %v1904_v7 = vld [vmem:[#allocation7 + $0x20] ss:$16 sps:$4 sm:$0xff]  }
  0x4e   :  { %336 = vmatpush1.bf16.msra.mxu0 %v1898_v3  ;;  %449 = vmatpush1.bf16.msra.mxu1 %v1899_v4  ;;  %v1905_v8 = vld [vmem:[#allocation7 + $0x28] ss:$16 sps:$4 sm:$0xff]   ;;  %v1906_v9 = vld [vmem:[#allocation7 + $0x44] ss:$16 sps:$4 sm:$0xff]   ;;  %v1908_v10 = vld [vmem:[#allocation7 + $0x4c] ss:$16 sps:$4 sm:$0xff]  }
  0x4f   :  { %337 = vmatprep.subr.bf16.mxu0 %v1900_v5  ;;  %450 = vmatprep.subr.bf16.mxu1 %v1902_v6  ;;  %v1910_v11 = vld [vmem:[#allocation7 + $0x40] ss:$16 sps:$4 sm:$0xff]   ;;  %v1911_v12 = vld [vmem:[#allocation7 + $0x48] ss:$16 sps:$4 sm:$0xff]   ;;  %v1912_v13 = vld [vmem:[#allocation7 + $0x64] ss:$16 sps:$4 sm:$0xff]  }
  0x50   :  { %v1914_v14 = vld [vmem:[#allocation7 + $0x6c] ss:$16 sps:$4 sm:$0xff]   ;;  %v1916_v15 = vld [vmem:[#allocation7 + $0x60] ss:$16 sps:$4 sm:$0xff]   ;;  %v1917_v16 = vld [vmem:[#allocation7 + $0x68] ss:$16 sps:$4 sm:$0xff]  }
  0x51   :  { %v1918_v17 = vld [vmem:[#allocation7 + $0x84] ss:$16 sps:$4 sm:$0xff]   ;;  %v1920_v18 = vld [vmem:[#allocation7 + $0x8c] ss:$16 sps:$4 sm:$0xff]   ;;  %v1922_v19 = vld [vmem:[#allocation7 + $0x80] ss:$16 sps:$4 sm:$0xff]  }
  0x52   :  { %338 = vmatpush1.bf16.msra.mxu0 %v1904_v7  ;;  %451 = vmatpush1.bf16.msra.mxu1 %v1905_v8  ;;  %v1923_v20 = vld [vmem:[#allocation7 + $0x88] ss:$16 sps:$4 sm:$0xff]   ;;  %v1924_v21 = vld [vmem:[#allocation7 + $0xa4] ss:$16 sps:$4 sm:$0xff]   ;;  %v1926_v22 = vld [vmem:[#allocation7 + $0xac] ss:$16 sps:$4 sm:$0xff]  }
  0x53   :  { %339 = vmatprep.subr.bf16.mxu0 %v1906_v9  ;;  %452 = vmatprep.subr.bf16.mxu1 %v1908_v10  ;;  %v1928_v23 = vld [vmem:[#allocation7 + $0xa0] ss:$16 sps:$4 sm:$0xff]   ;;  %v1929_v24 = vld [vmem:[#allocation7 + $0xa8] ss:$16 sps:$4 sm:$0xff]   ;;  %v1930_v25 = vld [vmem:[#allocation7 + $0xc4] ss:$16 sps:$4 sm:$0xff]  }
  0x54   :  { %v1932_v26 = vld [vmem:[#allocation7 + $0xcc] ss:$16 sps:$4 sm:$0xff]   ;;  %v1934_v27 = vld [vmem:[#allocation7 + $0xc0] ss:$16 sps:$4 sm:$0xff]   ;;  %v1935_v28 = vld [vmem:[#allocation7 + $0xc8] ss:$16 sps:$4 sm:$0xff]  }
  0x55   :  { %v1936_v29 = vld [vmem:[#allocation7 + $0xe4] ss:$16 sps:$4 sm:$0xff]   ;;  %v1938_v30 = vld [vmem:[#allocation7 + $0xec] ss:$16 sps:$4 sm:$0xff]   ;;  %v1940_v31 = vld [vmem:[#allocation7 + $0xe0] ss:$16 sps:$4 sm:$0xff]  }
  0x56   :  { %340 = vmatpush1.bf16.msra.mxu0 %v1910_v11  ;;  %453 = vmatpush1.bf16.msra.mxu1 %v1911_v12  ;;  %v1941_v32 = vld [vmem:[#allocation7 + $0xe8] ss:$16 sps:$4 sm:$0xff]   ;;  %v97_v33 = vld [vmem:[#allocation2] sm:$0xff]  ;;  %v99_v41 = vld [vmem:[#allocation2 + $0x10] sm:$0xff] }
  0x57   :  { %341 = vmatprep.subr.bf16.mxu0 %v1912_v13  ;;  %454 = vmatprep.subr.bf16.mxu1 %v1914_v14  ;;  %v1942_v35 = vld [vmem:[#allocation8 + $0x40] sm:$0xff]   ;;  %v113_v37 = vpack.c.bf16 %v98_v34, %v97_v33  ;;  %v1946_v40 = vld [vmem:[#allocation8 + $0x48] sm:$0xff]   ;;  %v100_v42 = vld [vmem:[#allocation2 + $0x18] sm:$0xff] }
  0x58   :  { %v1943_v36 = vld [vmem:[#allocation8 + $0xc0] sm:$0xff]   ;;  %v1947_v43 = vld [vmem:[#allocation8 + $0xc8] sm:$0xff]   ;;  %v1950_v46 = vld [vmem:[#allocation8 + $0x50] sm:$0xff]   ;;  %v114_v48 = vpack.c.bf16 %v100_v42, %v99_v41 }
  0x59   :  { %v1944_v38 = vld [vmem:[#allocation8] sm:$0xff]   ;;  %v1948_v44 = vld [vmem:[#allocation8 + $0x8] sm:$0xff]   ;;  %v1951_v47 = vld [vmem:[#allocation8 + $0xd0] sm:$0xff]  }
  0x5a   :  { %342 = vmatpush1.bf16.msra.mxu0 %v1916_v15  ;;  %455 = vmatpush1.bf16.msra.mxu1 %v1917_v16  ;;  %v1945_v39 = vld [vmem:[#allocation8 + $0x80] sm:$0xff]   ;;  %v1949_v45 = vld [vmem:[#allocation8 + $0x88] sm:$0xff]   ;;  %v1952_v49 = vld [vmem:[#allocation8 + $0x10] sm:$0xff]  }
  0x5b   :  { %343 = vmatprep.subr.bf16.mxu0 %v1918_v17  ;;  %456 = vmatprep.subr.bf16.mxu1 %v1920_v18  ;;  %v1953_v50 = vld [vmem:[#allocation8 + $0x90] sm:$0xff]   ;;  %v1954_v51 = vld [vmem:[#allocation8 + $0x58] sm:$0xff]   ;;  %v101_v52 = vld [vmem:[#allocation2 + $0x20] sm:$0xff] }
  0x5c   :  { %v102_v53 = vld [vmem:[#allocation2 + $0x28] sm:$0xff]  ;;  %v1955_v54 = vld [vmem:[#allocation8 + $0xd8] sm:$0xff]   ;;  %v1958_v57 = vld [vmem:[#allocation8 + $0x60] sm:$0xff]  }
  0x5d   :  { %v1956_v55 = vld [vmem:[#allocation8 + $0x18] sm:$0xff]   ;;  %v1959_v58 = vld [vmem:[#allocation8 + $0xe0] sm:$0xff]   ;;  %v115_v59 = vpack.c.bf16 %v102_v53, %v101_v52  ;;  %v103_v60 = vld [vmem:[#allocation2 + $0x30] sm:$0xff] }
  0x5e   :  { %344 = vmatpush1.bf16.msra.mxu0 %v1922_v19  ;;  %457 = vmatpush1.bf16.msra.mxu1 %v1923_v20  ;;  %v1957_v56 = vld [vmem:[#allocation8 + $0x98] sm:$0xff]   ;;  %v105_v63 = vld [vmem:[#allocation2 + $0x40] sm:$0xff]  ;;  %v106_v1 = vld [vmem:[#allocation2 + $0x48] sm:$0xff] }
  0x5f   :  { %345 = vmatprep.subr.bf16.mxu0 %v1924_v21  ;;  %458 = vmatprep.subr.bf16.mxu1 %v1926_v22  ;;  %v104_v61 = vld [vmem:[#allocation2 + $0x38] sm:$0xff]  ;;  %v117_v2 = vpack.c.bf16 %v106_v1, %v105_v63  ;;  %v107_v3 = vld [vmem:[#allocation2 + $0x50] sm:$0xff]  ;;  %v109_v6 = vld [vmem:[#allocation2 + $0x60] sm:$0xff] }
  0x60   :  { %v116_v62 = vpack.c.bf16 %v104_v61, %v103_v60  ;;  %v108_v4 = vld [vmem:[#allocation2 + $0x58] sm:$0xff]  ;;  %v110_v7 = vld [vmem:[#allocation2 + $0x68] sm:$0xff]  ;;  %v111_v9 = vld [vmem:[#allocation2 + $0x70] sm:$0xff] }
  0x61   :  { %v118_v5 = vpack.c.bf16 %v108_v4, %v107_v3  ;;  %v119_v8 = vpack.c.bf16 %v110_v7, %v109_v6  ;;  %v112_v10 = vld [vmem:[#allocation2 + $0x78] sm:$0xff]  ;;  %v1960_v12 = vld [vmem:[#allocation8 + $0x20] sm:$0xff]   ;;  %v1962_v14 = vld [vmem:[#allocation8 + $0x68] sm:$0xff]  }
  0x62   :  { %346 = vmatpush1.bf16.msra.mxu0 %v1928_v23  ;;  %459 = vmatpush1.bf16.msra.mxu1 %v1929_v24  ;;  %v120_v11 = vpack.c.bf16 %v112_v10, %v111_v9  ;;  %v1961_v13 = vld [vmem:[#allocation8 + $0xa0] sm:$0xff]   ;;  %v1963_v15 = vld [vmem:[#allocation8 + $0xe8] sm:$0xff]   ;;  %v1966_v18 = vld [vmem:[#allocation8 + $0x70] sm:$0xff]  }
  0x63   :  { %347 = vmatprep.subr.bf16.mxu0 %v1930_v25  ;;  %460 = vmatprep.subr.bf16.mxu1 %v1932_v26  ;;  %v1964_v16 = vld [vmem:[#allocation8 + $0x28] sm:$0xff]   ;;  %v1967_v19 = vld [vmem:[#allocation8 + $0xf0] sm:$0xff]   ;;  %v1970_v21 = vld [vmem:[#allocation8 + $0x78] sm:$0xff]   ;;  %v155_v25 = vlaneseq }
  0x64   :  { %v1965_v17 = vld [vmem:[#allocation8 + $0xa8] sm:$0xff]   ;;  %v1969_v20 = vld [vmem:[#allocation8 + $0xb0] sm:$0xff]   ;;  %v1971_v22 = vld [vmem:[#allocation8 + $0xf8] sm:$0xff]  }
  0x65   :  { %v1972_v23 = vld [vmem:[#allocation8 + $0x38] sm:$0xff]   ;;  %v156_v26 = vshrl.u32 %v155_v25, 7 }
  0x66   :  { %348 = vmatpush1.bf16.msra.mxu0 %v1934_v27  ;;  %461 = vmatpush1.bf16.msra.mxu1 %v1935_v28  ;;  %v1973_v24 = vld [vmem:[#allocation8 + $0xb8] sm:$0xff]  }
  0x67   :  { %349 = vmatprep.subr.bf16.mxu0 %v1936_v29  ;;  %462 = vmatprep.subr.bf16.mxu1 %v1938_v30  ;;  %v157_v27 = vsub.s32 0, %v156_v26  ;;  %v165_v28 = vsub.s32 2, %v156_v26  ;;  %v153_v29 = vld [vmem:[%s2954_s3] sm:$0xf]  ;;  %v161_v30 = vsub.s32 1, %v156_v26  ;;  %s2231_s3 = smov [#allocation10]  }
  0x68   :  { %s1675_s22 = sshll.u32 %s2231_s3, 4  ;;  %s1676_s22 = int_to_ptr.vmem [resolvable:$true] %s1675_s22 }
  0x69   :  { %v2344_v33 = vrot.slane %v153_v29, %v165_v28  ;;  %v2346_v34 = vrot.slane %v153_v29, %v161_v30  ;;  %s2190_s23 = scalar_lea.vmem %s1676_s22, 2048  ;;  %p2195_p5 = scmp.lt.s32.totalorder %s1676_s22, %s1676_s22 }
  0x6a   :  { %350 = vmatpush1.bf16.msra.mxu0 %v1940_v31  ;;  %463 = vmatpush1.bf16.msra.mxu1 %v1941_v32  ;;  %v169_v31 = vsub.s32 3, %v156_v26  ;;  %v2342_v32 = vrot.slane %v153_v29, %v157_v27  ;;  %p2191_p4 = scmp.ne.s32.totalorder %s1676_s22, %s2190_s23  ;;  %p2196_p6 = scmp.lt.s32.totalorder %s2190_s23, %s2190_s23 }
  0x6b   :  { %1753 = vmatprep.subr.bf16.mxu0 %v1942_v35  ;;  %1817 = vmatprep.subr.bf16.mxu1 %v1943_v36 }
  0x6c   :  { %v2348_v35 = vrot.slane %v153_v29, %v169_v31  ;;  %p2197_p7 = por %p2196_p6, %p2195_p5 }
  0x6d   :  { %368 = vmatmul.mubr.bf16.vlgmr.msra.gmra.mrb[0].mxu0 %v113_v37  ;;  %481 = vmatmul.mubr.bf16.vlgmr.msra.gmra.mrb[0].mxu1 %v113_v37 }
  0x6e   :  { %377 = vmatprep.mubr.bf16.mxu0 %v2230_v0  ;;  %490 = vmatprep.mubr.bf16.mxu1 %v2230_v0  ;;  %p2198_p8 = pnand %p2197_p7, %p2191_p4 }
  0x6f   :  { %1754 = vmatpush3.bf16.msra.mxu0 %v1944_v38  ;;  %1818 = vmatpush3.bf16.msra.mxu1 %v1945_v39 }
  0x70   :  { %1755 = vmatprep.subr.bf16.mxu0 %v1946_v40  ;;  %1819 = vmatprep.subr.bf16.mxu1 %v1947_v43 }
  0x73   :  { %1756 = vmatpush3.bf16.msra.mxu0 %v1948_v44  ;;  %1820 = vmatpush3.bf16.msra.mxu1 %v1949_v45 }
  0x74   :  { %1757 = vmatprep.subr.bf16.mxu0 %v1950_v46  ;;  %1821 = vmatprep.subr.bf16.mxu1 %v1951_v47 }
  0x75   :  { %378 = vmatmul.mubr.bf16.gmra.mrb[4].mxu0 %v114_v48  ;;  %491 = vmatmul.mubr.bf16.gmra.mrb[4].mxu1 %v114_v48 }
  0x76   :  { %387 = vmatprep.mubr.bf16.mxu0 %v2230_v0  ;;  %500 = vmatprep.mubr.bf16.mxu1 %v2230_v0 }
  0x77   :  { %1758 = vmatpush3.bf16.msra.mxu0 %v1952_v49  ;;  %1822 = vmatpush3.bf16.msra.mxu1 %v1953_v50 }
  0x78   :  { %1759 = vmatprep.subr.bf16.mxu0 %v1954_v51  ;;  %1823 = vmatprep.subr.bf16.mxu1 %v1955_v54 }
  0x7b   :  { %1760 = vmatpush3.bf16.msra.mxu0 %v1956_v55  ;;  %1824 = vmatpush3.bf16.msra.mxu1 %v1957_v56 }
  0x7c   :  { %1761 = vmatprep.subr.bf16.mxu0 %v1958_v57  ;;  %1825 = vmatprep.subr.bf16.mxu1 %v1959_v58 }
  0x7d   :  { %388 = vmatmul.mubr.bf16.gmra.mrb[8].mxu0 %v115_v59  ;;  %501 = vmatmul.mubr.bf16.gmra.mrb[8].mxu1 %v115_v59 }
  0x7e   :  { %397 = vmatprep.mubr.bf16.mxu0 %v2230_v0  ;;  %510 = vmatprep.mubr.bf16.mxu1 %v2230_v0 }
  0x7f   :  { %1762 = vmatpush3.bf16.msra.mxu0 %v1960_v12  ;;  %1826 = vmatpush3.bf16.msra.mxu1 %v1961_v13 }
  0x80   :  { %1763 = vmatprep.subr.bf16.mxu0 %v1962_v14  ;;  %1827 = vmatprep.subr.bf16.mxu1 %v1963_v15 }
  0x83   :  { %1764 = vmatpush3.bf16.msra.mxu0 %v1964_v16  ;;  %1828 = vmatpush3.bf16.msra.mxu1 %v1965_v17 }
  0x84   :  { %1765 = vmatprep.subr.bf16.mxu0 %v1966_v18  ;;  %1829 = vmatprep.subr.bf16.mxu1 %v1967_v19 }
  0x85   :  { %398 = vmatmul.mubr.bf16.gmra.mrb[12].mxu0 %v116_v62  ;;  %511 = vmatmul.mubr.bf16.gmra.mrb[12].mxu1 %v116_v62 }
  0x86   :  { %407 = vmatprep.mubr.bf16.mxu0 %v2230_v0  ;;  %520 = vmatprep.mubr.bf16.mxu1 %v2230_v0 }
  0x87   :  { %1830 = vmatpush3.bf16.msra.mxu1 %v1969_v20 }
  0x88   :  { %1831 = vmatprep.subr.bf16.mxu1 %v1971_v22 }
  0x8b   :  { %1832 = vmatpush3.bf16.msra.mxu1 %v1973_v24 }
  0x8d   :  { %408 = vmatmul.mubr.bf16.gmra.mrb[16].mxu0 %v117_v2  ;;  %521 = vmatmul.mubr.bf16.gmra.mrb[16].mxu1 %v117_v2 }
  0x8e   :  { %417 = vmatprep.mubr.bf16.mxu0 %v2230_v0  ;;  %530 = vmatprep.mubr.bf16.mxu1 %v2230_v0 }
  0x95   :  { %418 = vmatmul.mubr.bf16.gmra.mrb[20].mxu0 %v118_v5  ;;  %531 = vmatmul.mubr.bf16.gmra.mrb[20].mxu1 %v118_v5 }
  0x96   :  { %427 = vmatprep.mubr.bf16.mxu0 %v2230_v0  ;;  %540 = vmatprep.mubr.bf16.mxu1 %v2230_v0 }
  0x9d   :  { %428 = vmatmul.mubr.bf16.gmra.mrb[24].mxu0 %v119_v8  ;;  %541 = vmatmul.mubr.bf16.gmra.mrb[24].mxu1 %v119_v8 }
  0x9e   :  { %437 = vmatprep.mubr.bf16.mxu0 %v2230_v0  ;;  %550 = vmatprep.mubr.bf16.mxu1 %v2230_v0  ;;  %v1968_v0 = vld [vmem:[#allocation8 + $0x30] sm:$0xff]  }
  0x9f   :  { %1766 = vmatpush3.bf16.msra.mxu0 %v1968_v0 }
  0xa0   :  { %1767 = vmatprep.subr.bf16.mxu0 %v1970_v21 }
  0xa3   :  { %1768 = vmatpush3.bf16.msra.mxu0 %v1972_v23 }
  0xa5   :  { %438 = vmatmul.mubr.bf16.gmra.mrb[28].mxu0 %v120_v11  ;;  %551 = vmatmul.mubr.bf16.gmra.mrb[28].mxu1 %v120_v11 }
 0x140   :  { %v369_v36 = vpop.f32.mrb[0].mxu0  ;;  %v482_v37 = vpop.f32.mrb[0].mxu1 }
 0x141   :  { %v370_v38 = vadd.f32 %v369_v36, %v2342_v32  ;;  %v483_v39 = vadd.f32 %v482_v37, %v2344_v33  ;;  %v371_v40 = vpop.f32.mrb[1].mxu0  ;;  %v484_v41 = vpop.f32.mrb[1].mxu1 }
 0x142   :  { %v372_v42 = vadd.f32 %v371_v40, %v2346_v34  ;;  %v485_v43 = vadd.f32 %v484_v41, %v2348_v35  ;;  %v373_v44 = vpop.f32.mrb[2].mxu0  ;;  %v486_v45 = vpop.f32.mrb[2].mxu1 }
 0x143   :  { %v2354_v46 = vmul.f32 0.5, %v370_v38  ;;  %v625_v47 = vmul.f32 %v370_v38, %v370_v38  ;;  %v627_v48 = vmul.f32 %v483_v39, %v483_v39  ;;  %v375_v49 = vpop.f32.mrb[3].mxu0  ;;  %v488_v50 = vpop.f32.mrb[3].mxu1  ;;  %v2356_v51 = vmul.f32 0.5, %v483_v39 }
 0x144   :  { %v2358_v52 = vmul.f32 0.5, %v372_v42  ;;  %v626_v53 = vmul.f32 %v372_v42, %v372_v42  ;;  %v628_v54 = vmul.f32 %v485_v43, %v485_v43  ;;  %v374_v57 = vadd.f32 %v373_v44, %v2342_v32 }
 0x145   :  { %v689_v55 = vmul.f32 0.035677407, %v625_v47  ;;  %v691_v56 = vmul.f32 0.035677407, %v627_v48  ;;  %v487_v58 = vadd.f32 %v486_v45, %v2344_v33  ;;  %v2362_v60 = vmul.f32 0.5, %v485_v43 }
 0x146   :  { %v690_v59 = vmul.f32 0.035677407, %v626_v53  ;;  %v692_v61 = vmul.f32 0.035677407, %v628_v54  ;;  %v376_v62 = vadd.f32 %v375_v49, %v2346_v34  ;;  %v629_v2 = vmul.f32 %v374_v57, %v374_v57 }
 0x147   :  { %v753_v63 = vadd.f32 0.7978846, %v689_v55  ;;  %v755_v1 = vadd.f32 0.7978846, %v691_v56  ;;  %v489_v3 = vadd.f32 %v488_v50, %v2348_v35  ;;  %v2366_v6 = vmul.f32 0.5, %v374_v57 }
 0x148   :  { %v754_v4 = vadd.f32 0.7978846, %v690_v59  ;;  %v756_v5 = vadd.f32 0.7978846, %v692_v61  ;;  %v631_v7 = vmul.f32 %v487_v58, %v487_v58  ;;  %v379_v8 = vpop.f32.mrb[4].mxu0  ;;  %v2368_v12 = vmul.f32 0.5, %v487_v58 }
 0x149   :  { %v817_v9 = vmul.f32 %v753_v63, %v370_v38  ;;  %v819_v10 = vmul.f32 %v755_v1, %v483_v39  ;;  %v693_v11 = vmul.f32 0.035677407, %v629_v2  ;;  %v492_v13 = vpop.f32.mrb[4].mxu1  ;;  %v381_v14 = vpop.f32.mrb[5].mxu0  ;;  %v630_v18 = vmul.f32 %v376_v62, %v376_v62 }
 0x14a   :  { %v818_v15 = vmul.f32 %v754_v4, %v372_v42  ;;  %v820_v16 = vmul.f32 %v756_v5, %v485_v43  ;;  %v695_v17 = vmul.f32 0.035677407, %v631_v7  ;;  %v494_v19 = vpop.f32.mrb[5].mxu1  ;;  %v383_v0 = vpop.f32.mrb[6].mxu0  ;;  %v2370_v21 = vmul.f32 0.5, %v376_v62 }
 0x14b   :  { %1974 = vtanh.f32 %v817_v9  ;;  %v757_v20 = vadd.f32 0.7978846, %v693_v11  ;;  %v632_v22 = vmul.f32 %v489_v3, %v489_v3  ;;  %v496_v23 = vpop.f32.mrb[6].mxu1  ;;  %v385_v24 = vpop.f32.mrb[7].mxu0  ;;  %v694_v26 = vmul.f32 0.035677407, %v630_v18 }
 0x14c   :  { %1976 = vtanh.f32 %v819_v10  ;;  %v759_v25 = vadd.f32 0.7978846, %v695_v17  ;;  %v380_v27 = vadd.f32 %v379_v8, %v2342_v32  ;;  %v2373_v28 = vpop.f32.mrb[7].mxu1  ;;  %v493_v31 = vadd.f32 %v492_v13, %v2344_v33 }
 0x14d   :  { %1978 = vtanh.f32 %v818_v15  ;;  %v821_v29 = vmul.f32 %v757_v20, %v374_v57  ;;  %v696_v30 = vmul.f32 0.035677407, %v632_v22  ;;  %v758_v37 = vadd.f32 0.7978846, %v694_v26 }
 0x14e   :  { %1980 = vtanh.f32 %v820_v16  ;;  %v823_v36 = vmul.f32 %v759_v25, %v487_v58  ;;  %v2376_v38 = vmul.f32 0.5, %v489_v3  ;;  %v2378_v40 = vmul.f32 0.5, %v380_v27 }
 0x14f   :  { %1982 = vtanh.f32 %v821_v29  ;;  %v760_v39 = vadd.f32 0.7978846, %v696_v30  ;;  %v633_v41 = vmul.f32 %v380_v27, %v380_v27  ;;  %v822_v42 = vmul.f32 %v758_v37, %v376_v62 }
 0x150   :  { %2957 = vst [vmem:[#allocation15_spill] sm:$0xff] %v2378_v40  ;;  %1984 = vtanh.f32 %v823_v36  ;;  %v635_v43 = vmul.f32 %v493_v31, %v493_v31  ;;  %v382_v44 = vadd.f32 %v381_v14, %v2346_v34  ;;  %v2381_v45 = vpop.f32.mrb[8].mxu0  ;;  %v2383_v47 = vpop.f32.mrb[8].mxu1  ;;  %v495_v50 = vadd.f32 %v494_v19, %v2348_v35 }
 0x151   :  { %v824_v48 = vmul.f32 %v760_v39, %v489_v3  ;;  %v697_v49 = vmul.f32 0.035677407, %v633_v41  ;;  %v384_v53 = vadd.f32 %v383_v0, %v2342_v32  ;;  %v2387_v54 = vpop.f32.mrb[9].mxu0  ;;  %v2389_v55 = vpop.f32.mrb[9].mxu1  ;;  %1986 = vtanh.f32 %v822_v42 }
 0x152   :  { %v2391_v56 = vmul.f32 0.5, %v493_v31  ;;  %v699_v57 = vmul.f32 0.035677407, %v635_v43  ;;  %v634_v58 = vmul.f32 %v382_v44, %v382_v44  ;;  %v2393_v59 = vpop.f32.mrb[10].mxu0  ;;  %v2395_v61 = vpop.f32.mrb[10].mxu1  ;;  %v2397_v63 = vmul.f32 0.5, %v382_v44 }
 0x153   :  { %1988 = vtanh.f32 %v824_v48  ;;  %v761_v62 = vadd.f32 0.7978846, %v697_v49  ;;  %v636_v1 = vmul.f32 %v495_v50, %v495_v50  ;;  %v2399_v2 = vpop.f32.mrb[11].mxu0  ;;  %v2401_v3 = vpop.f32.mrb[11].mxu1  ;;  %v2403_v7 = vmul.f32 0.5, %v495_v50 }
 0x154   :  { %2958 = vst [vmem:[#allocation16_spill] sm:$0xff] %v2391_v56  ;;  %v763_v4 = vadd.f32 0.7978846, %v699_v57  ;;  %v698_v5 = vmul.f32 0.035677407, %v634_v58  ;;  %v637_v8 = vmul.f32 %v384_v53, %v384_v53  ;;  %v497_v13 = vadd.f32 %v496_v23, %v2344_v33 }
 0x155   :  { %v1975_v9 = vpop.eup %1974  ;;  %v825_v10 = vmul.f32 %v761_v62, %v380_v27  ;;  %v700_v11 = vmul.f32 0.035677407, %v636_v1  ;;  %v386_v14 = vadd.f32 %v385_v24, %v2346_v34  ;;  %v2409_v25 = vmul.f32 0.5, %v384_v53 }
 0x156   :  { %v1977_v15 = vpop.eup %1976  ;;  %v945_v16 = vadd.f32 1.0, %v1975_v9  ;;  %v827_v17 = vmul.f32 %v763_v4, %v493_v31  ;;  %v762_v18 = vadd.f32 0.7978846, %v698_v5  ;;  %v701_v19 = vmul.f32 0.035677407, %v637_v8 }
 0x157   :  { %v2407_v0 = vpop.eup %1978  ;;  %v947_v20 = vadd.f32 1.0, %v1977_v15  ;;  %1990 = vtanh.f32 %v825_v10  ;;  %v764_v22 = vadd.f32 0.7978846, %v700_v11  ;;  %2959 = vst [vmem:[#allocation17_spill] sm:$0xff] %v2409_v25  ;;  %v2416_v24 = vmul.f32 0.5, %v497_v13 }
 0x158   :  { %v2411_v26 = vpop.eup %1980  ;;  %v2414_v27 = vmul.f32 %v945_v16, %v2354_v46  ;;  %v826_v23 = vmul.f32 %v762_v18, %v382_v44  ;;  %v765_v29 = vadd.f32 0.7978846, %v701_v19  ;;  %v2418_v30 = vpop.f32.mrb[12].mxu0  ;;  %1992 = vtanh.f32 %v827_v17 }
 0x159   :  { %2960 = vst [vmem:[#allocation18_spill] sm:$0xff] %v2416_v24  ;;  %v2420_v31 = vpop.f32.mrb[12].mxu1  ;;  %v1983_v36 = vpop.eup %1982  ;;  %v2423_v37 = vmul.f32 %v947_v20, %v2356_v51  ;;  %v828_v39 = vmul.f32 %v764_v22, %v495_v50  ;;  %v639_v41 = vmul.f32 %v497_v13, %v497_v13  ;;  %v2429_v49 = vmul.f32 0.5, %v386_v14 }
 0x15a   :  { %v2425_v42 = vpop.f32.mrb[13].mxu0  ;;  %v2427_v43 = vpop.f32.mrb[13].mxu1  ;;  %v949_v44 = vadd.f32 1.0, %v1983_v36  ;;  %v829_v48 = vmul.f32 %v765_v29, %v384_v53  ;;  %v638_v57 = vmul.f32 %v386_v14, %v386_v14  ;;  %1994 = vtanh.f32 %v826_v23 }
 0x15b   :  { %v1985_v46 = vpop.eup %1984  ;;  %v2431_v58 = vpop.f32.mrb[14].mxu0  ;;  %v703_v51 = vmul.f32 0.035677407, %v639_v41  ;;  %v499_v50 = vadd.f32 %v2373_v28, %v2348_v35  ;;  %1996 = vtanh.f32 %v828_v39  ;;  %v390_v10 = vadd.f32 %v2381_v45, %v2342_v32 }
 0x15c   :  { %v2433_v62 = vpop.f32.mrb[14].mxu1  ;;  %v951_v1 = vadd.f32 1.0, %v1985_v46  ;;  %v2437_v4 = vpop.f32.mrb[15].mxu0  ;;  %v2444_v53 = vmul.f32 %v949_v44, %v2366_v6  ;;  %v702_v9 = vmul.f32 0.035677407, %v638_v57  ;;  %1998 = vtanh.f32 %v829_v48 }
 0x15d   :  { %v2439_v5 = vpop.f32.mrb[15].mxu1  ;;  %v2441_v8 = vpop.eup %1986  ;;  %v767_v28 = vadd.f32 0.7978846, %v703_v51  ;;  %v640_v16 = vmul.f32 %v499_v50, %v499_v50  ;;  %v2455_v19 = vmul.f32 0.5, %v499_v50  ;;  %v641_v6 = vmul.f32 %v390_v10, %v390_v10 }
 0x15e   :  { %v2448_v11 = vpop.eup %1988  ;;  %v2451_v15 = vmul.f32 %v951_v1, %v2368_v12  ;;  %v766_v18 = vadd.f32 0.7978846, %v702_v9  ;;  %v503_v23 = vadd.f32 %v2383_v47, %v2344_v33  ;;  %v392_v36 = vadd.f32 %v2387_v54, %v2346_v34 }
 0x15f   :  { %v831_v22 = vmul.f32 %v767_v28, %v497_v13  ;;  %v704_v45 = vmul.f32 0.035677407, %v640_v16  ;;  %v705_v29 = vmul.f32 0.035677407, %v641_v6  ;;  %v505_v39 = vadd.f32 %v2389_v55, %v2348_v35 }
 0x160   :  { %v830_v12 = vmul.f32 %v766_v18, %v386_v14  ;;  %v2465_v41 = vpop.f32.mrb[16].mxu0  ;;  %v2467_v46 = vpop.f32.mrb[16].mxu1  ;;  %v2471_v48 = vmul.f32 0.5, %v390_v10  ;;  %v643_v57 = vmul.f32 %v503_v23, %v503_v23  ;;  %v2477_v1 = vmul.f32 0.5, %v503_v23 }
 0x161   :  { %v2469_v44 = vpop.eup %1990  ;;  %2000 = vtanh.f32 %v831_v22  ;;  %v768_v13 = vadd.f32 0.7978846, %v704_v45  ;;  %v2473_v47 = vpop.f32.mrb[17].mxu0  ;;  %v769_v54 = vadd.f32 0.7978846, %v705_v29  ;;  %v642_v55 = vmul.f32 %v392_v36, %v392_v36 }
 0x162   :  { %2961 = vst [vmem:[#allocation19_spill] sm:$0xff] %v2471_v48  ;;  %v2475_v14 = vpop.f32.mrb[17].mxu1  ;;  %2002 = vtanh.f32 %v830_v12  ;;  %2962 = vst [vmem:[#allocation20_spill] sm:$0xff] %v2477_v1  ;;  %v2479_v51 = vpop.f32.mrb[18].mxu0  ;;  %v707_v18 = vmul.f32 0.035677407, %v643_v57  ;;  %v644_v22 = vmul.f32 %v505_v39, %v505_v39  ;;  %v394_v17 = vadd.f32 %v2393_v59, %v2342_v32 }
 0x163   :  { %v2481_v9 = vpop.f32.mrb[18].mxu1  ;;  %v2483_v28 = vpop.eup %1992  ;;  %v832_v16 = vmul.f32 %v768_v13, %v499_v50  ;;  %v2485_v6 = vmul.f32 0.5, %v392_v36  ;;  %v833_v12 = vmul.f32 %v769_v54, %v390_v10  ;;  %v706_v29 = vmul.f32 0.035677407, %v642_v55 }
 0x164   :  { %2963 = vst [vmem:[#allocation21_spill] sm:$0xff] %v2483_v28  ;;  %v2487_v45 = vpop.f32.mrb[19].mxu0  ;;  %v2489_v20 = vpop.f32.mrb[19].mxu1  ;;  %v507_v1 = vadd.f32 %v2395_v61, %v2344_v33  ;;  %v771_v50 = vadd.f32 0.7978846, %v707_v18  ;;  %v396_v57 = vadd.f32 %v2399_v2, %v2346_v34  ;;  %v2501_v10 = vmul.f32 0.5, %v505_v39 }
 0x165   :  { %2964 = vst [vmem:[#allocation22_spill] sm:$0xff] %v2485_v6  ;;  %v2495_v48 = vpop.eup %1994  ;;  %2004 = vtanh.f32 %v832_v16  ;;  %v708_v13 = vmul.f32 0.035677407, %v644_v22  ;;  %v770_v24 = vadd.f32 0.7978846, %v706_v29  ;;  %v645_v54 = vmul.f32 %v394_v17, %v394_v17 }
 0x166   :  { %v2499_v6 = vpop.eup %1996  ;;  %2006 = vtanh.f32 %v833_v12  ;;  %2965 = vst [vmem:[#allocation23_spill] sm:$0xff] %v2501_v10  ;;  %v835_v59 = vmul.f32 %v771_v50, %v503_v23  ;;  %v2505_v61 = vmul.f32 0.5, %v394_v17  ;;  %v647_v28 = vmul.f32 %v507_v1, %v507_v1 }
 0x167   :  { %v2503_v55 = vpop.eup %1998  ;;  %v772_v56 = vadd.f32 0.7978846, %v708_v13  ;;  %v834_v16 = vmul.f32 %v770_v24, %v392_v36  ;;  %v709_v18 = vmul.f32 0.035677407, %v645_v54  ;;  %v2507_v22 = vmul.f32 0.5, %v507_v1 }
 0x168   :  { %2966 = vst [vmem:[#allocation24_spill] sm:$0xff] %v2505_v61  ;;  %v646_v25 = vmul.f32 %v396_v57, %v396_v57  ;;  %v2509_v2 = vpop.f32.mrb[20].mxu0  ;;  %v2511_v40 = vpop.f32.mrb[20].mxu1  ;;  %2008 = vtanh.f32 %v835_v59  ;;  %v711_v29 = vmul.f32 0.035677407, %v647_v28  ;;  %v509_v10 = vadd.f32 %v2401_v3, %v2348_v35 }
 0x169   :  { %2967 = vst [vmem:[#allocation25_spill] sm:$0xff] %v2507_v22  ;;  %v836_v12 = vmul.f32 %v772_v56, %v505_v39  ;;  %v2515_v23 = vpop.f32.mrb[21].mxu0  ;;  %v2517_v50 = vpop.f32.mrb[21].mxu1  ;;  %2010 = vtanh.f32 %v834_v16  ;;  %v773_v24 = vadd.f32 0.7978846, %v709_v18  ;;  %v400_v13 = vadd.f32 %v2418_v30, %v2342_v32 }
 0x16a   :  { %2968 = vst [vmem:[#allocation26_spill] sm:$0xff] %v2515_v23  ;;  %2969 = vst [vmem:[#allocation27_spill] sm:$0xff] %v2517_v50  ;;  %v710_v36 = vmul.f32 0.035677407, %v646_v25  ;;  %v2521_v54 = vpop.f32.mrb[22].mxu0  ;;  %v2523_v22 = vpop.f32.mrb[22].mxu1  ;;  %v648_v3 = vmul.f32 %v509_v10, %v509_v10 }
 0x16b   :  { %2970 = vst [vmem:[#allocation28_spill] sm:$0xff] %v2521_v54  ;;  %2971 = vst [vmem:[#allocation29_spill] sm:$0xff] %v2523_v22  ;;  %v2525_v59 = vpop.eup %2000  ;;  %2012 = vtanh.f32 %v836_v12  ;;  %v775_v56 = vadd.f32 0.7978846, %v711_v29  ;;  %v2527_v39 = vmul.f32 0.5, %v396_v57  ;;  %v2529_v28 = vpop.f32.mrb[23].mxu0  ;;  %v837_v25 = vmul.f32 %v773_v24, %v394_v17 }
 0x16c   :  { %2973 = vst [vmem:[#allocation31_spill] sm:$0xff] %v2529_v28  ;;  %v2531_v61 = vpop.f32.mrb[23].mxu1  ;;  %v2533_v16 = vpop.eup %2002  ;;  %v774_v18 = vadd.f32 0.7978846, %v710_v36  ;;  %v2535_v30 = vmul.f32 0.5, %v509_v10  ;;  %v649_v54 = vmul.f32 %v400_v13, %v400_v13  ;;  %v513_v12 = vadd.f32 %v2420_v31, %v2344_v33 }
 0x16d   :  { %2972 = vst [vmem:[#allocation30_spill] sm:$0xff] %v2527_v39  ;;  %2974 = vst [vmem:[#allocation32_spill] sm:$0xff] %v2531_v61  ;;  %v839_v50 = vmul.f32 %v775_v56, %v507_v1  ;;  %v712_v22 = vmul.f32 0.035677407, %v648_v3  ;;  %v402_v29 = vadd.f32 %v2425_v42, %v2346_v34  ;;  %2014 = vtanh.f32 %v837_v25 }
 0x16e   :  { %2975 = vst [vmem:[#allocation33_spill] sm:$0xff] %v2535_v30  ;;  %v838_v39 = vmul.f32 %v774_v18, %v396_v57  ;;  %v713_v28 = vmul.f32 0.035677407, %v649_v54  ;;  %v515_v61 = vadd.f32 %v2427_v43, %v2348_v35  ;;  %v2545_v24 = vmul.f32 0.5, %v400_v13 }
 0x16f   :  { %v2543_v23 = vpop.eup %2004  ;;  %2016 = vtanh.f32 %v839_v50  ;;  %v776_v17 = vadd.f32 0.7978846, %v712_v22  ;;  %v651_v1 = vmul.f32 %v513_v12, %v513_v12  ;;  %v2549_v56 = vmul.f32 0.5, %v513_v12 }
 0x170   :  { %2976 = vst [vmem:[#allocation34_spill] sm:$0xff] %v2545_v24  ;;  %v2547_v36 = vpop.eup %2006  ;;  %2018 = vtanh.f32 %v838_v39  ;;  %v777_v31 = vadd.f32 0.7978846, %v713_v28  ;;  %v650_v42 = vmul.f32 %v402_v29, %v402_v29  ;;  %v2551_v3 = vpop.f32.mrb[24].mxu0  ;;  %v2555_v25 = vmul.f32 0.5, %v402_v29 }
 0x171   :  { %2977 = vst [vmem:[#allocation35_spill] sm:$0xff] %v2547_v36  ;;  %2978 = vst [vmem:[#allocation36_spill] sm:$0xff] %v2549_v56  ;;  %v2553_v57 = vpop.f32.mrb[24].mxu1  ;;  %v840_v54 = vmul.f32 %v776_v17, %v509_v10  ;;  %v715_v43 = vmul.f32 0.035677407, %v651_v1  ;;  %v652_v50 = vmul.f32 %v515_v61, %v515_v61  ;;  %v2557_v22 = vpop.f32.mrb[25].mxu0  ;;  %v404_v39 = vadd.f32 %v2431_v58, %v2342_v32 }
 0x172   :  { %2979 = vst [vmem:[#allocation37_spill] sm:$0xff] %v2553_v57  ;;  %2980 = vst [vmem:[#allocation38_spill] sm:$0xff] %v2555_v25  ;;  %v2559_v18 = vpop.f32.mrb[25].mxu1  ;;  %v841_v24 = vmul.f32 %v777_v31, %v400_v13  ;;  %v714_v36 = vmul.f32 0.035677407, %v650_v42  ;;  %v517_v28 = vadd.f32 %v2433_v62, %v2344_v33  ;;  %v2565_v56 = vpop.f32.mrb[26].mxu0  ;;  %v406_v25 = vadd.f32 %v2437_v4, %v2346_v34 }
 0x173   :  { %2981 = vst [vmem:[#allocation39_spill] sm:$0xff] %v2557_v22  ;;  %2982 = vst [vmem:[#allocation40_spill] sm:$0xff] %v2559_v18  ;;  %v2567_v57 = vpop.f32.mrb[26].mxu1  ;;  %v2569_v10 = vpop.eup %2008  ;;  %2020 = vtanh.f32 %v840_v54  ;;  %v779_v17 = vadd.f32 0.7978846, %v715_v43  ;;  %v2579_v42 = vmul.f32 0.5, %v515_v61 }
 0x174   :  { %2983 = vst [vmem:[#allocation41_spill] sm:$0xff] %v2565_v56  ;;  %2984 = vst [vmem:[#allocation42_spill] sm:$0xff] %v2567_v57  ;;  %v716_v1 = vmul.f32 0.035677407, %v652_v50  ;;  %v2573_v13 = vpop.f32.mrb[27].mxu0  ;;  %v2575_v31 = vpop.f32.mrb[27].mxu1  ;;  %2022 = vtanh.f32 %v841_v24  ;;  %v653_v56 = vmul.f32 %v404_v39, %v404_v39  ;;  %v655_v50 = vmul.f32 %v517_v28, %v517_v28 }
 0x175   :  { %2985 = vst [vmem:[#allocation43_spill] sm:$0xff] %v2569_v10  ;;  %2986 = vst [vmem:[#allocation44_spill] sm:$0xff] %v2573_v13  ;;  %v2577_v58 = vpop.eup %2010  ;;  %v778_v62 = vadd.f32 0.7978846, %v714_v36  ;;  %v843_v18 = vmul.f32 %v779_v17, %v513_v12  ;;  %v2583_v43 = vmul.f32 0.5, %v404_v39  ;;  %v2585_v10 = vmul.f32 0.5, %v517_v28 }
 0x176   :  { %2987 = vst [vmem:[#allocation45_spill] sm:$0xff] %v2575_v31  ;;  %2988 = vst [vmem:[#allocation46_spill] sm:$0xff] %v2579_v42  ;;  %v2581_v57 = vpop.eup %2012  ;;  %v780_v54 = vadd.f32 0.7978846, %v716_v1  ;;  %v717_v4 = vmul.f32 0.035677407, %v653_v56  ;;  %v654_v13 = vmul.f32 %v406_v25, %v406_v25  ;;  %v519_v24 = vadd.f32 %v2439_v5, %v2348_v35 }
 0x177   :  { %2989 = vst [vmem:[#allocation47_spill] sm:$0xff] %v2583_v43  ;;  %v842_v22 = vmul.f32 %v778_v62, %v402_v29  ;;  %2990 = vst [vmem:[#allocation48_spill] sm:$0xff] %v2585_v10  ;;  %2024 = vtanh.f32 %v843_v18  ;;  %v719_v30 = vmul.f32 0.035677407, %v655_v50  ;;  %v2589_v36 = vpop.eup %2014  ;;  %v946_v17 = vadd.f32 1.0, %v2407_v0 }
 0x178   :  { %v844_v31 = vmul.f32 %v780_v54, %v515_v61  ;;  %v781_v42 = vadd.f32 0.7978846, %v717_v4  ;;  %v718_v12 = vmul.f32 0.035677407, %v654_v13  ;;  %v2592_v1 = vpop.f32.mrb[28].mxu0  ;;  %v2596_v62 = vmul.f32 0.5, %v406_v25 }
 0x179   :  { %2026 = vtanh.f32 %v842_v22  ;;  %2991 = vst [vmem:[#allocation49_spill] sm:$0xff] %v2592_v1  ;;  %v2594_v29 = vpop.eup %2016  ;;  %v783_v56 = vadd.f32 0.7978846, %v719_v30  ;;  %v656_v61 = vmul.f32 %v519_v24, %v519_v24  ;;  %v2598_v18 = vpop.f32.mrb[28].mxu1  ;;  %v950_v13 = vadd.f32 1.0, %v2441_v8 }
 0x17a   :  { %2028 = vtanh.f32 %v844_v31  ;;  %2992 = vst [vmem:[#allocation50_spill] sm:$0xff] %v2598_v18  ;;  %v2600_v54 = vpop.f32.mrb[29].mxu0  ;;  %v2602_v5 = vpop.eup %2018  ;;  %v845_v22 = vmul.f32 %v781_v42, %v404_v39  ;;  %v782_v50 = vadd.f32 0.7978846, %v718_v12  ;;  %v1010_v0 = vmul.f32 %v946_v17, %v2358_v52 }
 0x17b   :  { %2993 = vst [vmem:[#allocation51_spill] sm:$0xff] %v2600_v54  ;;  %v2606_v4 = vpop.f32.mrb[29].mxu1  ;;  %v2608_v10 = vpop.f32.mrb[30].mxu0  ;;  %v847_v30 = vmul.f32 %v783_v56, %v517_v28  ;;  %v720_v31 = vmul.f32 0.035677407, %v656_v61  ;;  %v948_v43 = vadd.f32 1.0, %v2411_v26  ;;  %v1014_v8 = vmul.f32 %v950_v13, %v2370_v21 }
 0x17c   :  { %v952_v18 = vadd.f32 1.0, %v2448_v11  ;;  %v2612_v1 = vpop.f32.mrb[30].mxu1  ;;  %v2614_v54 = vpop.f32.mrb[31].mxu0  ;;  %2030 = vtanh.f32 %v845_v22  ;;  %v846_v39 = vmul.f32 %v782_v50, %v406_v25  ;;  %v410_v52 = vadd.f32 %v2465_v41, %v2342_v32 }
 0x17d   :  { %v2619_v42 = vpop.f32.mrb[31].mxu1  ;;  %v2621_v12 = vpop.eup %2020  ;;  %2032 = vtanh.f32 %v847_v30  ;;  %v784_v28 = vadd.f32 0.7978846, %v720_v31  ;;  %v1012_v26 = vmul.f32 %v948_v43, %v2362_v60  ;;  %v2627_v56 = vmul.f32 0.5, %v519_v24 }
 0x17e   :  { %v1016_v11 = vmul.f32 %v952_v18, %v2376_v38  ;;  %v2625_v17 = vpop.eup %2022  ;;  %2034 = vtanh.f32 %v846_v39  ;;  %v1090_v25 = vpack.c.bf16 %v1014_v8, %v1010_v0  ;;  %v657_v21 = vmul.f32 %v410_v52, %v410_v52 }
 0x17f   :  { %v2629_v22 = vmul.f32 0.5, %v410_v52  ;;  %v523_v41 = vadd.f32 %v2467_v46, %v2344_v33  ;;  %v412_v50 = vadd.f32 %v2473_v47, %v2346_v34  ;;  %v525_v38 = vadd.f32 %v2475_v14, %v2348_v35 }
 0x180   :  { %v1092_v61 = vpack.c.bf16 %v1016_v11, %v1012_v26  ;;  %1409 = vmatprep.mubr.bf16.mxu0 %v1090_v25  ;;  %v721_v60 = vmul.f32 0.035677407, %v657_v21  ;;  %v414_v43 = vadd.f32 %v2479_v51, %v2342_v32  ;;  %v527_v18 = vadd.f32 %v2481_v9, %v2344_v33 }
 0x181   :  { %2994 = vst [vmem:[#allocation52_spill] sm:$0xff] %v2629_v22  ;;  %v2641_v13 = vpop.eup %2024  ;;  %v848_v0 = vmul.f32 %v784_v28, %v519_v24  ;;  %v2643_v30 = vmul.f32 0.5, %v523_v41  ;;  %v659_v46 = vmul.f32 %v523_v41, %v523_v41  ;;  %v2996_v47 = vpack.c.bf16 %v2444_v53, %v2414_v27 }
 0x182   :  { %1506 = vmatprep.mubr.bf16.mxu1 %v1092_v61  ;;  %v2648_v31 = vmul.f32 0.5, %v412_v50  ;;  %v785_v39 = vadd.f32 0.7978846, %v721_v60  ;;  %v2998_v51 = vpack.c.bf16 %v2451_v15, %v2423_v37  ;;  %v658_v9 = vmul.f32 %v412_v50, %v412_v50 }
 0x183   :  { %2995 = vst [vmem:[#allocation53_spill] sm:$0xff] %v2643_v30  ;;  %1410 = vmatmul.mubr.bf16.vlgmr.msra.gmra.mrb[32].mxu0 %v2996_v47  ;;  %v2650_v14 = vpop.eup %2026  ;;  %v2655_v8 = vmul.f32 0.5, %v525_v38  ;;  %v660_v24 = vmul.f32 %v525_v38, %v525_v38  ;;  %v723_v26 = vmul.f32 0.035677407, %v659_v46  ;;  %v2659_v11 = vmul.f32 0.5, %v414_v43 }
 0x184   :  { %2997 = vst [vmem:[#allocation54_spill] sm:$0xff] %v2648_v31  ;;  %1507 = vmatmul.mubr.bf16.vlgmr.msra.gmra.mrb[32].mxu1 %v2998_v51  ;;  %v2657_v28 = vpop.eup %2028  ;;  %v661_v27 = vmul.f32 %v414_v43, %v414_v43  ;;  %v2661_v53 = vmul.f32 0.5, %v527_v18  ;;  %v849_v25 = vmul.f32 %v785_v39, %v410_v52  ;;  %v722_v21 = vmul.f32 0.035677407, %v658_v9 }
 0x185   :  { %2999 = vst [vmem:[#allocation55_spill] sm:$0xff] %v2655_v8  ;;  %3000 = vst [vmem:[#allocation56_spill] sm:$0xff] %v2659_v11  ;;  %v724_v61 = vmul.f32 0.035677407, %v660_v24  ;;  %v663_v60 = vmul.f32 %v527_v18, %v527_v18  ;;  %v787_v47 = vadd.f32 0.7978846, %v723_v26  ;;  %v416_v37 = vadd.f32 %v2487_v45, %v2346_v34 }
 0x186   :  { %3001 = vst [vmem:[#allocation57_spill] sm:$0xff] %v2661_v53  ;;  %v725_v30 = vmul.f32 0.035677407, %v661_v27  ;;  %v529_v15 = vadd.f32 %v2489_v20, %v2348_v35  ;;  %v2667_v51 = vpop.eup %2030  ;;  %2036 = vtanh.f32 %v848_v0  ;;  %v786_v46 = vadd.f32 0.7978846, %v722_v21 }
 0x187   :  { %v788_v11 = vadd.f32 0.7978846, %v724_v61  ;;  %v727_v22 = vmul.f32 0.035677407, %v663_v60  ;;  %v2669_v8 = vpop.eup %2032  ;;  %2038 = vtanh.f32 %v849_v25  ;;  %v851_v52 = vmul.f32 %v787_v47, %v523_v41 }
 0x188   :  { %v789_v39 = vadd.f32 0.7978846, %v725_v30  ;;  %v662_v9 = vmul.f32 %v416_v37, %v416_v37  ;;  %v2671_v24 = vpop.eup %2034  ;;  %v850_v26 = vmul.f32 %v786_v46, %v412_v50  ;;  %v2673_v53 = vmul.f32 0.5, %v416_v37 }
 0x189   :  { %v852_v27 = vmul.f32 %v788_v11, %v525_v38  ;;  %v791_v45 = vadd.f32 0.7978846, %v727_v22  ;;  %2040 = vtanh.f32 %v851_v52  ;;  %v664_v0 = vmul.f32 %v529_v15, %v529_v15 }
 0x18a   :  { %v853_v20 = vmul.f32 %v789_v39, %v414_v43  ;;  %v726_v31 = vmul.f32 0.035677407, %v662_v9  ;;  %2042 = vtanh.f32 %v850_v26  ;;  %v954_v61 = vadd.f32 1.0, %v2495_v48  ;;  %v3004_v39 = vld [vmem:[#allocation15_spill] sm:$0xff]  ;;  %v3005_v26 = vld [vmem:[#allocation17_spill] sm:$0xff] }
 0x18b   :  { %v855_v21 = vmul.f32 %v791_v45, %v527_v18  ;;  %v958_v25 = vadd.f32 1.0, %v2533_v16  ;;  %2044 = vtanh.f32 %v852_v27  ;;  %v728_v30 = vmul.f32 0.035677407, %v664_v0 }
 0x18c   :  { %v790_v41 = vadd.f32 0.7978846, %v726_v31  ;;  %v956_v60 = vadd.f32 1.0, %v2499_v6  ;;  %2046 = vtanh.f32 %v853_v20  ;;  %v1018_v22 = vmul.f32 %v954_v61, %v2397_v63  ;;  %v3007_v20 = vld [vmem:[#allocation26_spill] sm:$0xff] }
 0x18d   :  { %v1022_v50 = vmul.f32 %v958_v25, %v2429_v49  ;;  %v960_v38 = vadd.f32 1.0, %v2543_v23  ;;  %2048 = vtanh.f32 %v855_v21  ;;  %v792_v11 = vadd.f32 0.7978846, %v728_v30 }
 0x18e   :  { %v854_v43 = vmul.f32 %v790_v41, %v416_v37  ;;  %v1020_v18 = vmul.f32 %v956_v60, %v2403_v7  ;;  %v420_v31 = vadd.f32 %v2509_v2, %v2342_v32  ;;  %v533_v6 = vadd.f32 %v2511_v40, %v2344_v33  ;;  %v3008_v41 = vld [vmem:[#allocation27_spill] sm:$0xff]  ;;  %v3009_v60 = vld [vmem:[#allocation28_spill] sm:$0xff] }
 0x18f   :  { %v1094_v48 = vpack.c.bf16 %v1022_v50, %v1018_v22  ;;  %v1024_v16 = vmul.f32 %v960_v38, %v2455_v19  ;;  %v2687_v63 = vmul.f32 0.5, %v529_v15  ;;  %v953_v49 = vadd.f32 1.0, %v2469_v44 }
 0x190   :  { %2050 = vtanh.f32 %v854_v43  ;;  %v957_v23 = vadd.f32 1.0, %v2503_v55  ;;  %v2691_v47 = vpop.eup %2036  ;;  %v856_v37 = vmul.f32 %v792_v11, %v529_v15  ;;  %v2693_v46 = vmul.f32 0.5, %v420_v31  ;;  %v3006_v55 = vld [vmem:[#allocation21_spill] sm:$0xff]  ;;  %v3010_v43 = vld [vmem:[#allocation16_spill] sm:$0xff] }
 0x191   :  { %1417 = vmatprep.mubr.bf16.mxu0 %v1094_v48  ;;  %v1096_v7 = vpack.c.bf16 %v1024_v16, %v1020_v18  ;;  %v665_v19 = vmul.f32 %v420_v31, %v420_v31  ;;  %v2695_v52 = vpop.eup %2038  ;;  %v2697_v2 = vmul.f32 0.5, %v533_v6  ;;  %v667_v40 = vmul.f32 %v533_v6, %v533_v6 }
 0x192   :  { %3002 = vst [vmem:[#allocation58_spill] sm:$0xff] %v2693_v46  ;;  %v1017_v9 = vmul.f32 %v953_v49, %v3004_v39  ;;  %v1021_v27 = vmul.f32 %v957_v23, %v3005_v26  ;;  %v955_v45 = vadd.f32 1.0, %v3006_v55  ;;  %v959_v15 = vadd.f32 1.0, %v2525_v59  ;;  %v3011_v59 = vld [vmem:[#allocation18_spill] sm:$0xff] }
 0x193   :  { %3003 = vst [vmem:[#allocation59_spill] sm:$0xff] %v2697_v2  ;;  %1514 = vmatprep.mubr.bf16.mxu1 %v1096_v7  ;;  %v729_v44 = vmul.f32 0.035677407, %v665_v19  ;;  %v422_v0 = vadd.f32 %v3007_v20, %v2346_v34  ;;  %v2705_v21 = vpop.eup %2040  ;;  %v731_v61 = vmul.f32 0.035677407, %v667_v40  ;;  %v535_v30 = vadd.f32 %v3008_v41, %v2348_v35  ;;  %v3021_v2 = vld [vmem:[#allocation37_spill] sm:$0xff] }
 0x194   :  { %v1093_v25 = vpack.c.bf16 %v1021_v27, %v1017_v9  ;;  %v424_v22 = vadd.f32 %v3009_v60, %v2342_v32  ;;  %v2711_v50 = vpop.eup %2042  ;;  %2052 = vtanh.f32 %v856_v37  ;;  %v1019_v11 = vmul.f32 %v955_v45, %v3010_v43  ;;  %v3012_v45 = vld [vmem:[#allocation29_spill] sm:$0xff] }
 0x195   :  { %v793_v38 = vadd.f32 0.7978846, %v729_v44  ;;  %v1023_v18 = vmul.f32 %v959_v15, %v3011_v59  ;;  %v2715_v48 = vpop.eup %2044  ;;  %v795_v16 = vadd.f32 0.7978846, %v731_v61  ;;  %v2717_v49 = vmul.f32 0.5, %v422_v0  ;;  %v3013_v61 = vld [vmem:[#allocation31_spill] sm:$0xff] }
 0x196   :  { %1418 = vmatmul.mubr.bf16.gmra.mrb[36].mxu0 %v1093_v25  ;;  %v666_v23 = vmul.f32 %v422_v0, %v422_v0  ;;  %v668_v7 = vmul.f32 %v535_v30, %v535_v30  ;;  %v2719_v19 = vpop.eup %2046  ;;  %v2721_v9 = vmul.f32 0.5, %v535_v30  ;;  %v669_v37 = vmul.f32 %v424_v22, %v424_v22 }
 0x197   :  { %v857_v40 = vmul.f32 %v793_v38, %v420_v31  ;;  %v1095_v39 = vpack.c.bf16 %v1023_v18, %v1019_v11  ;;  %v2723_v26 = vpop.eup %2048  ;;  %v859_v27 = vmul.f32 %v795_v16, %v533_v6  ;;  %v537_v15 = vadd.f32 %v3012_v45, %v2344_v33  ;;  %v3014_v31 = vld [vmem:[#allocation32_spill] sm:$0xff] }
 0x198   :  { %v730_v44 = vmul.f32 0.035677407, %v666_v23  ;;  %v732_v55 = vmul.f32 0.035677407, %v668_v7  ;;  %v733_v20 = vmul.f32 0.035677407, %v669_v37  ;;  %v426_v25 = vadd.f32 %v3013_v61, %v2346_v34 }
 0x199   :  { %2054 = vtanh.f32 %v857_v40  ;;  %1515 = vmatmul.mubr.bf16.gmra.mrb[36].mxu1 %v1095_v39  ;;  %v539_v41 = vadd.f32 %v3014_v31, %v2348_v35  ;;  %v2733_v6 = vmul.f32 0.5, %v424_v22  ;;  %v2735_v59 = vmul.f32 0.5, %v537_v15 }
 0x19a   :  { %v2731_v60 = vpop.eup %2050  ;;  %2056 = vtanh.f32 %v859_v27  ;;  %v794_v38 = vadd.f32 0.7978846, %v730_v44  ;;  %v796_v43 = vadd.f32 0.7978846, %v732_v55  ;;  %v797_v11 = vadd.f32 0.7978846, %v733_v20 }
 0x19b   :  { %3015 = vst [vmem:[#allocation15_spill] sm:$0xff] %v2733_v6  ;;  %3016 = vst [vmem:[#allocation17_spill] sm:$0xff] %v2735_v59  ;;  %v671_v18 = vmul.f32 %v537_v15, %v537_v15  ;;  %v670_v16 = vmul.f32 %v426_v25, %v426_v25  ;;  %v2737_v40 = vmul.f32 0.5, %v426_v25  ;;  %v672_v39 = vmul.f32 %v539_v41, %v539_v41 }
 0x19c   :  { %v858_v23 = vmul.f32 %v794_v38, %v422_v0  ;;  %v860_v7 = vmul.f32 %v796_v43, %v535_v30  ;;  %v861_v37 = vmul.f32 %v797_v11, %v424_v22  ;;  %v962_v31 = vadd.f32 1.0, %v2577_v58  ;;  %v3017_v43 = vld [vmem:[#allocation22_spill] sm:$0xff] }
 0x19d   :  { %v735_v45 = vmul.f32 0.035677407, %v671_v18  ;;  %v734_v61 = vmul.f32 0.035677407, %v670_v16  ;;  %v736_v27 = vmul.f32 0.035677407, %v672_v39 }
 0x19e   :  { %2058 = vtanh.f32 %v858_v23  ;;  %v966_v44 = vadd.f32 1.0, %v2602_v5  ;;  %v964_v55 = vadd.f32 1.0, %v2581_v57  ;;  %v2742_v20 = vpop.eup %2052  ;;  %v2744_v30 = vmul.f32 0.5, %v539_v41  ;;  %v3018_v11 = vld [vmem:[#allocation30_spill] sm:$0xff]  ;;  %v3019_v39 = vld [vmem:[#allocation23_spill] sm:$0xff] }
 0x19f   :  { %2060 = vtanh.f32 %v860_v7  ;;  %v799_v59 = vadd.f32 0.7978846, %v735_v45  ;;  %v798_v0 = vadd.f32 0.7978846, %v734_v61  ;;  %v800_v38 = vadd.f32 0.7978846, %v736_v27 }
 0x1a0   :  { %v1026_v22 = vmul.f32 %v962_v31, %v3017_v43  ;;  %v1030_v18 = vmul.f32 %v966_v44, %v3018_v11  ;;  %v968_v58 = vadd.f32 1.0, %v2621_v12  ;;  %2062 = vtanh.f32 %v861_v37  ;;  %v3020_v45 = vld [vmem:[#allocation33_spill] sm:$0xff]  ;;  %v3022_v12 = vld [vmem:[#allocation35_spill] sm:$0xff] }
 0x1a1   :  { %v863_v16 = vmul.f32 %v799_v59, %v537_v15  ;;  %v862_v23 = vmul.f32 %v798_v0, %v426_v25  ;;  %v430_v57 = vadd.f32 %v2551_v3, %v2342_v32  ;;  %v1028_v7 = vmul.f32 %v964_v55, %v3019_v39  ;;  %v3026_v43 = vld [vmem:[#allocation19_spill] sm:$0xff] }
 0x1a2   :  { %v1098_v5 = vpack.c.bf16 %v1030_v18, %v1026_v22  ;;  %v1032_v61 = vmul.f32 %v968_v58, %v3020_v45  ;;  %v543_v27 = vadd.f32 %v3021_v2, %v2344_v33  ;;  %v864_v31 = vmul.f32 %v800_v38, %v539_v41  ;;  %v3027_v38 = vld [vmem:[#allocation43_spill] sm:$0xff] }
 0x1a3   :  { %v2755_v6 = vpop.eup %2054  ;;  %2064 = vtanh.f32 %v863_v16  ;;  %v673_v44 = vmul.f32 %v430_v57, %v430_v57  ;;  %v961_v37 = vadd.f32 1.0, %v3022_v12  ;;  %v2760_v25 = vmul.f32 0.5, %v430_v57  ;;  %v3028_v58 = vld [vmem:[#allocation39_spill] sm:$0xff] }
 0x1a4   :  { %v2758_v15 = vpop.eup %2056  ;;  %2066 = vtanh.f32 %v862_v23  ;;  %1425 = vmatprep.mubr.bf16.mxu0 %v1098_v5  ;;  %v1100_v3 = vpack.c.bf16 %v1032_v61, %v1028_v7  ;;  %v675_v59 = vmul.f32 %v543_v27, %v543_v27  ;;  %v2762_v0 = vmul.f32 0.5, %v543_v27  ;;  %v3029_v5 = vld [vmem:[#allocation24_spill] sm:$0xff]  ;;  %v3031_v61 = vld [vmem:[#allocation41_spill] sm:$0xff] }
 0x1a5   :  { %3023 = vst [vmem:[#allocation21_spill] sm:$0xff] %v2758_v15  ;;  %3024 = vst [vmem:[#allocation26_spill] sm:$0xff] %v2760_v25  ;;  %v737_v55 = vmul.f32 0.035677407, %v673_v44  ;;  %v965_v2 = vadd.f32 1.0, %v2589_v36  ;;  %v1025_v22 = vmul.f32 %v961_v37, %v3026_v43  ;;  %v963_v11 = vadd.f32 1.0, %v3027_v38 }
 0x1a6   :  { %3025 = vst [vmem:[#allocation27_spill] sm:$0xff] %v2762_v0  ;;  %1522 = vmatprep.mubr.bf16.mxu1 %v1100_v3  ;;  %v739_v41 = vmul.f32 0.035677407, %v675_v59  ;;  %v967_v18 = vadd.f32 1.0, %v2594_v29  ;;  %v432_v16 = vadd.f32 %v3028_v58, %v2346_v34  ;;  %v3030_v7 = vld [vmem:[#allocation40_spill] sm:$0xff]  ;;  %v434_v36 = vadd.f32 %v3031_v61, %v2342_v32  ;;  %v3033_v59 = vld [vmem:[#allocation25_spill] sm:$0xff] }
 0x1a7   :  { %v801_v23 = vadd.f32 0.7978846, %v737_v55  ;;  %v1029_v39 = vmul.f32 %v965_v2, %v3029_v5  ;;  %v545_v45 = vadd.f32 %v3030_v7, %v2348_v35  ;;  %2068 = vtanh.f32 %v864_v31  ;;  %v3032_v37 = vld [vmem:[#allocation20_spill] sm:$0xff] }
 0x1a8   :  { %v2775_v44 = vpop.eup %2058  ;;  %v803_v12 = vadd.f32 0.7978846, %v739_v41  ;;  %v1027_v3 = vmul.f32 %v963_v11, %v3032_v37  ;;  %v1031_v29 = vmul.f32 %v967_v18, %v3033_v59  ;;  %v2781_v58 = vmul.f32 0.5, %v432_v16  ;;  %v3037_v18 = vld [vmem:[#allocation42_spill] sm:$0xff] }
 0x1a9   :  { %v2779_v43 = vpop.eup %2060  ;;  %v865_v38 = vmul.f32 %v801_v23, %v430_v57  ;;  %v1097_v55 = vpack.c.bf16 %v1029_v39, %v1025_v22  ;;  %v674_v2 = vmul.f32 %v432_v16, %v432_v16  ;;  %v2783_v0 = vmul.f32 0.5, %v545_v45  ;;  %v3038_v22 = vld [vmem:[#allocation44_spill] sm:$0xff]  ;;  %v3039_v23 = vld [vmem:[#allocation45_spill] sm:$0xff] }
 0x1aa   :  { %3034 = vst [vmem:[#allocation28_spill] sm:$0xff] %v2781_v58  ;;  %v867_v5 = vmul.f32 %v803_v12, %v543_v27  ;;  %v1099_v7 = vpack.c.bf16 %v1031_v29, %v1027_v3  ;;  %v676_v61 = vmul.f32 %v545_v45, %v545_v45  ;;  %v2785_v25 = vpop.eup %2062  ;;  %v2787_v41 = vmul.f32 0.5, %v434_v36 }
 0x1ab   :  { %3035 = vst [vmem:[#allocation16_spill] sm:$0xff] %v2783_v0  ;;  %1426 = vmatmul.mubr.bf16.gmra.mrb[40].mxu0 %v1097_v55  ;;  %v738_v31 = vmul.f32 0.035677407, %v674_v2  ;;  %v677_v11 = vmul.f32 %v434_v36, %v434_v36  ;;  %v547_v37 = vadd.f32 %v3037_v18, %v2344_v33  ;;  %2070 = vtanh.f32 %v865_v38 }
 0x1ac   :  { %3036 = vst [vmem:[#allocation18_spill] sm:$0xff] %v2787_v41  ;;  %1523 = vmatmul.mubr.bf16.gmra.mrb[40].mxu1 %v1099_v7  ;;  %v740_v57 = vmul.f32 0.035677407, %v676_v61  ;;  %v436_v27 = vadd.f32 %v3038_v22, %v2346_v34  ;;  %v549_v39 = vadd.f32 %v3039_v23, %v2348_v35  ;;  %2072 = vtanh.f32 %v867_v5 }
 0x1ad   :  { %v2795_v12 = vpop.eup %2064  ;;  %v802_v3 = vadd.f32 0.7978846, %v738_v31  ;;  %v741_v59 = vmul.f32 0.035677407, %v677_v11  ;;  %v679_v29 = vmul.f32 %v547_v37, %v547_v37  ;;  %v2799_v41 = vmul.f32 0.5, %v547_v37 }
 0x1ae   :  { %3040 = vst [vmem:[#allocation29_spill] sm:$0xff] %v2795_v12  ;;  %v2797_v55 = vpop.eup %2066  ;;  %v804_v2 = vadd.f32 0.7978846, %v740_v57  ;;  %v2801_v38 = vmul.f32 0.5, %v436_v27  ;;  %v678_v7 = vmul.f32 %v436_v27, %v436_v27  ;;  %v680_v0 = vmul.f32 %v549_v39, %v549_v39 }
 0x1af   :  { %3041 = vst [vmem:[#allocation31_spill] sm:$0xff] %v2799_v41  ;;  %v866_v61 = vmul.f32 %v802_v3, %v432_v16  ;;  %v805_v18 = vadd.f32 0.7978846, %v741_v59  ;;  %v743_v22 = vmul.f32 0.035677407, %v679_v29  ;;  %v970_v46 = vadd.f32 1.0, %v2650_v14 }
 0x1b0   :  { %3042 = vst [vmem:[#allocation32_spill] sm:$0xff] %v2801_v38  ;;  %v868_v58 = vmul.f32 %v804_v2, %v545_v45  ;;  %v742_v23 = vmul.f32 0.035677407, %v678_v7  ;;  %v974_v5 = vadd.f32 1.0, %v2671_v24  ;;  %v744_v12 = vmul.f32 0.035677407, %v680_v0 }
 0x1b1   :  { %2074 = vtanh.f32 %v866_v61  ;;  %v869_v31 = vmul.f32 %v805_v18, %v434_v36  ;;  %v807_v11 = vadd.f32 0.7978846, %v743_v22  ;;  %v2805_v57 = vpop.eup %2068  ;;  %v3043_v38 = vld [vmem:[#allocation38_spill] sm:$0xff]  ;;  %v972_v59 = vadd.f32 1.0, %v2657_v28  ;;  %v3044_v36 = vld [vmem:[#allocation49_spill] sm:$0xff] }
 0x1b2   :  { %2076 = vtanh.f32 %v868_v58  ;;  %v806_v41 = vadd.f32 0.7978846, %v742_v23  ;;  %v1034_v15 = vmul.f32 %v970_v46, %v3043_v38  ;;  %v1038_v16 = vmul.f32 %v974_v5, %v2596_v62  ;;  %v3045_v46 = vld [vmem:[#allocation50_spill] sm:$0xff] }
 0x1b3   :  { %2078 = vtanh.f32 %v869_v31  ;;  %v871_v3 = vmul.f32 %v807_v11, %v547_v37  ;;  %v808_v45 = vadd.f32 0.7978846, %v744_v12  ;;  %v976_v24 = vadd.f32 1.0, %v2691_v47  ;;  %v3046_v37 = vld [vmem:[#allocation46_spill] sm:$0xff]  ;;  %v3047_v31 = vld [vmem:[#allocation51_spill] sm:$0xff] }
 0x1b4   :  { %v870_v14 = vmul.f32 %v806_v41, %v436_v27  ;;  %v1102_v29 = vpack.c.bf16 %v1038_v16, %v1034_v15  ;;  %v440_v0 = vadd.f32 %v3044_v36, %v2342_v32  ;;  %v2813_v2 = vmul.f32 0.5, %v549_v39  ;;  %v3051_v36 = vld [vmem:[#allocation48_spill] sm:$0xff] }
 0x1b5   :  { %2080 = vtanh.f32 %v871_v3  ;;  %v872_v58 = vmul.f32 %v808_v45, %v549_v39  ;;  %v553_v38 = vadd.f32 %v3045_v46, %v2344_v33  ;;  %v2817_v62 = vpop.eup %2070  ;;  %v1036_v28 = vmul.f32 %v972_v59, %v3046_v37  ;;  %v3048_v3 = vld [vmem:[#allocation34_spill] sm:$0xff]  ;;  %v3049_v59 = vld [vmem:[#allocation47_spill] sm:$0xff] }
 0x1b6   :  { %2082 = vtanh.f32 %v870_v14  ;;  %1433 = vmatprep.mubr.bf16.mxu0 %v1102_v29  ;;  %v1040_v15 = vmul.f32 %v976_v24, %v2627_v56  ;;  %v681_v41 = vmul.f32 %v440_v0, %v440_v0  ;;  %v2821_v47 = vpop.eup %2072  ;;  %v2823_v27 = vmul.f32 0.5, %v440_v0  ;;  %v3050_v29 = vld [vmem:[#allocation36_spill] sm:$0xff] }
 0x1b7   :  { %2084 = vtanh.f32 %v872_v58  ;;  %v683_v12 = vmul.f32 %v553_v38, %v553_v38  ;;  %v969_v39 = vadd.f32 1.0, %v2625_v17  ;;  %v973_v18 = vadd.f32 1.0, %v2667_v51 }
 0x1b8   :  { %v1104_v7 = vpack.c.bf16 %v1040_v15, %v1036_v28  ;;  %v745_v61 = vmul.f32 0.035677407, %v681_v41  ;;  %v971_v22 = vadd.f32 1.0, %v2641_v13  ;;  %v2828_v23 = vmul.f32 0.5, %v553_v38 }
 0x1b9   :  { %v747_v5 = vmul.f32 0.035677407, %v683_v12  ;;  %v975_v56 = vadd.f32 1.0, %v2669_v8  ;;  %v442_v11 = vadd.f32 %v3047_v31, %v2346_v34  ;;  %v1033_v45 = vmul.f32 %v969_v39, %v3048_v3 }
 0x1ba   :  { %1530 = vmatprep.mubr.bf16.mxu1 %v1104_v7  ;;  %v809_v16 = vadd.f32 0.7978846, %v745_v61  ;;  %v1037_v17 = vmul.f32 %v973_v18, %v3049_v59  ;;  %v555_v14 = vadd.f32 %v2606_v4, %v2348_v35  ;;  %v1035_v24 = vmul.f32 %v971_v22, %v3050_v29 }
 0x1bb   :  { %v2837_v51 = vpop.eup %2074  ;;  %v811_v13 = vadd.f32 0.7978846, %v747_v5  ;;  %v1039_v58 = vmul.f32 %v975_v56, %v3051_v36  ;;  %v682_v8 = vmul.f32 %v442_v11, %v442_v11  ;;  %v2843_v15 = vmul.f32 0.5, %v442_v11 }
 0x1bc   :  { %v2841_v46 = vpop.eup %2076  ;;  %v873_v37 = vmul.f32 %v809_v16, %v440_v0  ;;  %v1101_v28 = vpack.c.bf16 %v1037_v17, %v1033_v45  ;;  %v684_v41 = vmul.f32 %v555_v14, %v555_v14  ;;  %v444_v61 = vadd.f32 %v2608_v10, %v2342_v32 }
 0x1bd   :  { %v2845_v12 = vpop.eup %2078  ;;  %v875_v39 = vmul.f32 %v811_v13, %v553_v38  ;;  %v1103_v7 = vpack.c.bf16 %v1039_v58, %v1035_v24  ;;  %v746_v4 = vmul.f32 0.035677407, %v682_v8  ;;  %v557_v22 = vadd.f32 %v2612_v1, %v2344_v33 }
 0x1be   :  { %2086 = vtanh.f32 %v873_v37  ;;  %1434 = vmatmul.mubr.bf16.gmra.mrb[44].mxu0 %v1101_v28  ;;  %v748_v18 = vmul.f32 0.035677407, %v684_v41  ;;  %v446_v0 = vadd.f32 %v2614_v54, %v2346_v34  ;;  %v2855_v38 = vmul.f32 0.5, %v555_v14  ;;  %v3052_v28 = vld [vmem:[#allocation54_spill] sm:$0xff] }
 0x1bf   :  { %v2853_v5 = vpop.eup %2080  ;;  %2088 = vtanh.f32 %v875_v39  ;;  %1531 = vmatmul.mubr.bf16.gmra.mrb[44].mxu1 %v1103_v7  ;;  %v810_v56 = vadd.f32 0.7978846, %v746_v4  ;;  %v685_v31 = vmul.f32 %v444_v61, %v444_v61  ;;  %v2859_v10 = vmul.f32 0.5, %v444_v61 }
 0x1c0   :  { %v2857_v16 = vpop.eup %2082  ;;  %v812_v32 = vadd.f32 0.7978846, %v748_v18  ;;  %v2861_v3 = vmul.f32 0.5, %v557_v22  ;;  %v687_v45 = vmul.f32 %v557_v22, %v557_v22  ;;  %v686_v54 = vmul.f32 %v446_v0, %v446_v0 }
 0x1c1   :  { %v2863_v33 = vpop.eup %2084  ;;  %v874_v1 = vmul.f32 %v810_v56, %v442_v11  ;;  %v749_v34 = vmul.f32 0.035677407, %v685_v31  ;;  %v2867_v59 = vadd.f32 %v2619_v42, %v2348_v35  ;;  %v978_v29 = vadd.f32 1.0, %v2711_v50  ;;  %v3053_v31 = vld [vmem:[#allocation55_spill] sm:$0xff] }
 0x1c2   :  { %v876_v17 = vmul.f32 %v812_v32, %v555_v14  ;;  %v751_v13 = vmul.f32 0.035677407, %v687_v45  ;;  %v982_v24 = vadd.f32 1.0, %v2731_v60  ;;  %v2871_v58 = vmul.f32 0.5, %v446_v0 }
 0x1c3   :  { %2090 = vtanh.f32 %v874_v1  ;;  %v813_v36 = vadd.f32 0.7978846, %v749_v34  ;;  %v750_v8 = vmul.f32 0.035677407, %v686_v54  ;;  %v688_v11 = vmul.f32 %v2867_v59, %v2867_v59 }
 0x1c4   :  { %2092 = vtanh.f32 %v876_v17  ;;  %v815_v37 = vadd.f32 0.7978846, %v751_v13  ;;  %v1042_v41 = vmul.f32 %v978_v29, %v3052_v28  ;;  %v1046_v14 = vmul.f32 %v982_v24, %v2673_v53  ;;  %v3055_v17 = vld [vmem:[#allocation56_spill] sm:$0xff] }
 0x1c5   :  { %v877_v35 = vmul.f32 %v813_v36, %v444_v61  ;;  %v814_v42 = vadd.f32 0.7978846, %v750_v8  ;;  %v980_v50 = vadd.f32 1.0, %v2715_v48  ;;  %v752_v60 = vmul.f32 0.035677407, %v688_v11 }
 0x1c6   :  { %v879_v39 = vmul.f32 %v815_v37, %v557_v22  ;;  %v984_v7 = vadd.f32 1.0, %v2742_v20  ;;  %v977_v4 = vadd.f32 1.0, %v2695_v52  ;;  %v1106_v56 = vpack.c.bf16 %v1046_v14, %v1042_v41  ;;  %v3054_v20 = vld [vmem:[#allocation52_spill] sm:$0xff] }
 0x1c7   :  { %2094 = vtanh.f32 %v877_v35  ;;  %v878_v18 = vmul.f32 %v814_v42, %v446_v0  ;;  %v1044_v32 = vmul.f32 %v980_v50, %v3053_v31  ;;  %v816_v61 = vadd.f32 0.7978846, %v752_v60  ;;  %v3058_v50 = vld [vmem:[#allocation21_spill] sm:$0xff]  ;;  %v3062_v31 = vld [vmem:[#allocation59_spill] sm:$0xff] }
 0x1c8   :  { %v2881_v45 = vpop.eup %2086  ;;  %2096 = vtanh.f32 %v879_v39  ;;  %v1048_v1 = vmul.f32 %v984_v7, %v2687_v63  ;;  %v981_v53 = vadd.f32 1.0, %v2719_v19  ;;  %1441 = vmatprep.mubr.bf16.mxu0 %v1106_v56  ;;  %v1041_v22 = vmul.f32 %v977_v4, %v3054_v20  ;;  %v3056_v63 = vld [vmem:[#allocation53_spill] sm:$0xff]  ;;  %v3060_v7 = vld [vmem:[#allocation58_spill] sm:$0xff]  ;;  %v3065_v20 = vld [vmem:[#allocation32_spill] sm:$0xff] }
 0x1c9   :  { %v2885_v48 = vpop.eup %2088  ;;  %2098 = vtanh.f32 %v878_v18  ;;  %v979_v52 = vadd.f32 1.0, %v2705_v21  ;;  %v983_v0 = vadd.f32 1.0, %v2723_v26  ;;  %v880_v34 = vmul.f32 %v816_v61, %v2867_v59  ;;  %v3057_v19 = vld [vmem:[#allocation57_spill] sm:$0xff] }
 0x1ca   :  { %v1108_v54 = vpack.c.bf16 %v1048_v1, %v1044_v32  ;;  %v1045_v13 = vmul.f32 %v981_v53, %v3055_v17  ;;  %v986_v29 = vadd.f32 1.0, %v2775_v44  ;;  %v990_v8 = vadd.f32 1.0, %v2797_v55  ;;  %v3059_v60 = vld [vmem:[#allocation29_spill] sm:$0xff]  ;;  %v3064_v1 = vld [vmem:[#allocation28_spill] sm:$0xff] }
 0x1cb   :  { %v1043_v24 = vmul.f32 %v979_v52, %v3056_v63  ;;  %v1047_v36 = vmul.f32 %v983_v0, %v3057_v19  ;;  %v988_v37 = vadd.f32 1.0, %v2779_v43  ;;  %2100 = vtanh.f32 %v880_v34  ;;  %v3066_v63 = vld [vmem:[#allocation16_spill] sm:$0xff] }
 0x1cc   :  { %1538 = vmatprep.mubr.bf16.mxu1 %v1108_v54  ;;  %v1105_v21 = vpack.c.bf16 %v1045_v13, %v1041_v22  ;;  %v1050_v26 = vmul.f32 %v986_v29, %v2717_v49  ;;  %v992_v11 = vadd.f32 1.0, %v2805_v57  ;;  %v1054_v35 = vmul.f32 %v990_v8, %v2737_v40  ;;  %v3067_v8 = vld [vmem:[#allocation26_spill] sm:$0xff] }
 0x1cd   :  { %v2091_v28 = vpop.eup %2090  ;;  %v1107_v41 = vpack.c.bf16 %v1047_v36, %v1043_v24  ;;  %v1052_v44 = vmul.f32 %v988_v37, %v2721_v9  ;;  %v985_v42 = vadd.f32 1.0, %v2755_v6  ;;  %v989_v43 = vadd.f32 1.0, %v2785_v25  ;;  %v3061_v6 = vld [vmem:[#allocation15_spill] sm:$0xff]  ;;  %v3068_v37 = vld [vmem:[#allocation18_spill] sm:$0xff] }
 0x1ce   :  { %v2093_v14 = vpop.eup %2092  ;;  %1442 = vmatmul.mubr.bf16.gmra.mrb[48].mxu0 %v1105_v21  ;;  %v1056_v55 = vmul.f32 %v992_v11, %v2744_v30  ;;  %v987_v39 = vadd.f32 1.0, %v3058_v50  ;;  %v991_v49 = vadd.f32 1.0, %v3059_v60  ;;  %v1110_v57 = vpack.c.bf16 %v1054_v35, %v1050_v26  ;;  %v3063_v30 = vld [vmem:[#allocation17_spill] sm:$0xff] }
 0x1cf   :  { %1539 = vmatmul.mubr.bf16.gmra.mrb[48].mxu1 %v1107_v41  ;;  %v1049_v4 = vmul.f32 %v985_v42, %v3060_v7  ;;  %v994_v40 = vadd.f32 1.0, %v2837_v51  ;;  %v998_v9 = vadd.f32 1.0, %v2857_v16  ;;  %v1053_v56 = vmul.f32 %v989_v43, %v3061_v6  ;;  %v3069_v42 = vld [vmem:[#allocation27_spill] sm:$0xff] }
 0x1d0   :  { %v1112_v18 = vpack.c.bf16 %v1056_v55, %v1052_v44  ;;  %v1051_v32 = vmul.f32 %v987_v39, %v3062_v31  ;;  %v1055_v61 = vmul.f32 %v991_v49, %v3063_v30  ;;  %1449 = vmatprep.mubr.bf16.mxu0 %v1110_v57  ;;  %v996_v52 = vadd.f32 1.0, %v2841_v46 }
 0x1d1   :  { %v2095_v25 = vpop.eup %2094  ;;  %v1058_v53 = vmul.f32 %v994_v40, %v3064_v1  ;;  %v1062_v22 = vmul.f32 %v998_v9, %v3065_v20  ;;  %v1000_v0 = vadd.f32 1.0, %v2863_v33  ;;  %v1109_v16 = vpack.c.bf16 %v1053_v56, %v1049_v4  ;;  %v1622_v1 = vld [vmem:[#allocation5] sm:$0xff]  ;;  %v1623_v20 = vld [vmem:[#allocation5 + $0x8] sm:$0xff] }
 0x1d2   :  { %v2097_v51 = vpop.eup %2096  ;;  %1546 = vmatprep.mubr.bf16.mxu1 %v1112_v18  ;;  %v1111_v34 = vpack.c.bf16 %v1055_v61, %v1051_v32  ;;  %v993_v54 = vadd.f32 1.0, %v2817_v62  ;;  %v997_v17 = vadd.f32 1.0, %v2845_v12  ;;  %v1060_v24 = vmul.f32 %v996_v52, %v3066_v63 }
 0x1d3   :  { %v2099_v13 = vpop.eup %2098  ;;  %v1114_v29 = vpack.c.bf16 %v1062_v22, %v1058_v53  ;;  %v1064_v19 = vmul.f32 %v1000_v0, %v2813_v2  ;;  %v995_v36 = vadd.f32 1.0, %v2821_v47  ;;  %v999_v21 = vadd.f32 1.0, %v2853_v5  ;;  %v3070_v2 = vld [vmem:[#allocation31_spill] sm:$0xff] }
 0x1d4   :  { %v1057_v46 = vmul.f32 %v993_v54, %v3067_v8  ;;  %v1061_v33 = vmul.f32 %v997_v17, %v3068_v37  ;;  %v1002_v26 = vadd.f32 1.0, %v2091_v28  ;;  %v624_v11 = vmul.f32 0.5, %v2867_v59 }
 0x1d5   :  { %v1116_v62 = vpack.c.bf16 %v1064_v19, %v1060_v24  ;;  %v1006_v41 = vadd.f32 1.0, %v2099_v13  ;;  %v1004_v12 = vadd.f32 1.0, %v2093_v14  ;;  %v2101_v35 = vpop.eup %2100  ;;  %v1059_v55 = vmul.f32 %v995_v36, %v3069_v42 }
 0x1d6   :  { %1450 = vmatmul.mubr.bf16.gmra.mrb[52].mxu0 %v1109_v16  ;;  %v1113_v44 = vpack.c.bf16 %v1061_v33, %v1057_v46  ;;  %v1063_v43 = vmul.f32 %v999_v21, %v3070_v2  ;;  %v1001_v47 = vadd.f32 1.0, %v2881_v45  ;;  %v1066_v50 = vmul.f32 %v1002_v26, %v2843_v15  ;;  %v1624_v46 = vld [vmem:[#allocation5 + $0x10] sm:$0xff]  ;;  %v1625_v33 = vld [vmem:[#allocation5 + $0x18] sm:$0xff] }
 0x1d7   :  { %1547 = vmatmul.mubr.bf16.gmra.mrb[52].mxu1 %v1111_v34  ;;  %1457 = vmatprep.mubr.bf16.mxu0 %v1114_v29  ;;  %v1070_v5 = vmul.f32 %v1006_v41, %v2871_v58  ;;  %v1008_v28 = vadd.f32 1.0, %v2101_v35  ;;  %v1005_v59 = vadd.f32 1.0, %v2095_v25  ;;  %v1068_v14 = vmul.f32 %v1004_v12, %v2855_v38 }
 0x1d8   :  { %1554 = vmatprep.mubr.bf16.mxu1 %v1116_v62  ;;  %v1115_v39 = vpack.c.bf16 %v1063_v43, %v1059_v55  ;;  %v1003_v60 = vadd.f32 1.0, %v2885_v48  ;;  %v1007_v49 = vadd.f32 1.0, %v2097_v51  ;;  %v1065_v4 = vmul.f32 %v1001_v47, %v2823_v27 }
 0x1d9   :  { %v1118_v57 = vpack.c.bf16 %v1070_v5, %v1066_v50  ;;  %v1072_v7 = vmul.f32 %v1008_v28, %v624_v11  ;;  %v1069_v45 = vmul.f32 %v1005_v59, %v2859_v10  ;;  %v1626_v28 = vld [vmem:[#allocation5 + $0x20] sm:$0xff] }
 0x1da   :  { %v1067_v40 = vmul.f32 %v1003_v60, %v2828_v23  ;;  %v1071_v15 = vmul.f32 %v1007_v49, %v2861_v3 }
 0x1db   :  { %v1120_v58 = vpack.c.bf16 %v1072_v7, %v1068_v14  ;;  %v1117_v9 = vpack.c.bf16 %v1069_v45, %v1065_v4 }
 0x1dc   :  { %v1119_v18 = vpack.c.bf16 %v1071_v15, %v1067_v40 }
 0x1de   :  { %1458 = vmatmul.mubr.bf16.gmra.mrb[56].mxu0 %v1113_v44 }
 0x1df   :  { %1555 = vmatmul.mubr.bf16.gmra.mrb[56].mxu1 %v1115_v39  ;;  %1465 = vmatprep.mubr.bf16.mxu0 %v1118_v57  ;;  %v1627_v39 = vld [vmem:[#allocation5 + $0x28] sm:$0xff] }
 0x1e0   :  { %1562 = vmatprep.mubr.bf16.mxu1 %v1120_v58 }
 0x1e6   :  { %1466 = vmatmul.mubr.bf16.gmra.mrb[60].mxu0 %v1117_v9 }
 0x1e7   :  { %1563 = vmatmul.mubr.bf16.gmra.mrb[60].mxu1 %v1119_v18 }
 0x256   :  { %v1769_v38 = vpop.f32.mrb[32].mxu0 }
 0x257   :  { %v1833_v48 = vpop.f32.mrb[32].mxu1  ;;  %v1770_v6 = vpop.f32.mrb[33].mxu0 }
 0x258   :  { %v1771_v56 = vadd.f32 %v1770_v6, %v1769_v38  ;;  %v1834_v27 = vpop.f32.mrb[33].mxu1  ;;  %v1772_v31 = vpop.f32.mrb[34].mxu0 }
 0x259   :  { %v1835_v10 = vadd.f32 %v1834_v27, %v1833_v48  ;;  %v1836_v32 = vpop.f32.mrb[34].mxu1  ;;  %v1773_v23 = vpop.f32.mrb[35].mxu0 }
 0x25a   :  { %v1774_v30 = vadd.f32 %v1773_v23, %v1772_v31  ;;  %v1837_v3 = vpop.f32.mrb[35].mxu1  ;;  %v1629_v31 = vld [vmem:[#allocation5 + $0x38] sm:$0xff] }
 0x25b   :  { %v1509_v61 = vadd.f32 %v1835_v10, %v1771_v56  ;;  %v1838_v25 = vadd.f32 %v1837_v3, %v1836_v32  ;;  %v1628_v56 = vld [vmem:[#allocation5 + $0x30] sm:$0xff] }
 0x25d   :  { %v1512_v53 = vadd.f32 %v1838_v25, %v1774_v30  ;;  %v1638_v22 = vmul.f32 %v1622_v1, %v1509_v61 }
 0x25f   :  { %1654 = vst [vmem:[#allocation10] sm:$0xff] %v1638_v22  ;;  %v1639_v52 = vmul.f32 %v1623_v20, %v1512_v53 }
 0x261   :  { %1655 = vst [vmem:[#allocation10 + $0x8] sm:$0xff] %v1639_v52 }
 0x269   :  { %v1775_v0 = vpop.f32.mrb[36].mxu0 }
 0x26a   :  { %v1776_v51 = vpop.f32.mrb[37].mxu0 }
 0x26b   :  { %v1777_v16 = vadd.f32 %v1776_v51, %v1775_v0  ;;  %v1778_v34 = vpop.f32.mrb[38].mxu0 }
 0x26c   :  { %v1839_v54 = vpop.f32.mrb[36].mxu1  ;;  %v1779_v17 = vpop.f32.mrb[39].mxu0 }
 0x26d   :  { %v1840_v13 = vpop.f32.mrb[37].mxu1  ;;  %v1780_v29 = vadd.f32 %v1779_v17, %v1778_v34  ;;  %v1630_v34 = vld [vmem:[#allocation5 + $0x40] sm:$0xff]  ;;  %v1631_v17 = vld [vmem:[#allocation5 + $0x48] sm:$0xff] }
 0x26e   :  { %v1841_v63 = vadd.f32 %v1840_v13, %v1839_v54  ;;  %v1842_v24 = vpop.f32.mrb[38].mxu1 }
 0x26f   :  { %v1843_v19 = vpop.f32.mrb[39].mxu1 }
 0x270   :  { %v1517_v36 = vadd.f32 %v1841_v63, %v1777_v16  ;;  %v1844_v8 = vadd.f32 %v1843_v19, %v1842_v24 }
 0x272   :  { %v1520_v37 = vadd.f32 %v1844_v8, %v1780_v29  ;;  %v1640_v21 = vmul.f32 %v1624_v46, %v1517_v36 }
 0x274   :  { %1656 = vst [vmem:[#allocation10 + $0x10] sm:$0xff] %v1640_v21  ;;  %v1641_v26 = vmul.f32 %v1625_v33, %v1520_v37 }
 0x276   :  { %1657 = vst [vmem:[#allocation10 + $0x18] sm:$0xff] %v1641_v26 }
 0x27e   :  { %v1781_v11 = vpop.f32.mrb[40].mxu0 }
 0x27f   :  { %v1845_v62 = vpop.f32.mrb[40].mxu1  ;;  %v1782_v41 = vpop.f32.mrb[41].mxu0 }
 0x280   :  { %v1783_v12 = vadd.f32 %v1782_v41, %v1781_v11  ;;  %v1846_v35 = vpop.f32.mrb[41].mxu1  ;;  %v1784_v44 = vpop.f32.mrb[42].mxu0 }
 0x281   :  { %v1847_v42 = vadd.f32 %v1846_v35, %v1845_v62  ;;  %v1848_v55 = vpop.f32.mrb[42].mxu1  ;;  %v1785_v2 = vpop.f32.mrb[43].mxu0 }
 0x282   :  { %v1786_v43 = vadd.f32 %v1785_v2, %v1784_v44  ;;  %v1849_v47 = vpop.f32.mrb[43].mxu1  ;;  %v1633_v44 = vld [vmem:[#allocation5 + $0x58] sm:$0xff] }
 0x283   :  { %v1525_v50 = vadd.f32 %v1847_v42, %v1783_v12  ;;  %v1850_v5 = vadd.f32 %v1849_v47, %v1848_v55  ;;  %v1632_v12 = vld [vmem:[#allocation5 + $0x50] sm:$0xff] }
 0x285   :  { %v1528_v59 = vadd.f32 %v1850_v5, %v1786_v43  ;;  %v1642_v14 = vmul.f32 %v1626_v28, %v1525_v50 }
 0x287   :  { %1658 = vst [vmem:[#allocation10 + $0x20] sm:$0xff] %v1642_v14  ;;  %v1643_v60 = vmul.f32 %v1627_v39, %v1528_v59 }
 0x289   :  { %1659 = vst [vmem:[#allocation10 + $0x28] sm:$0xff] %v1643_v60 }
 0x291   :  { %v1787_v49 = vpop.f32.mrb[44].mxu0 }
 0x292   :  { %v1851_v57 = vpop.f32.mrb[44].mxu1  ;;  %v1788_v7 = vpop.f32.mrb[45].mxu0 }
 0x293   :  { %v1789_v4 = vadd.f32 %v1788_v7, %v1787_v49  ;;  %v1852_v45 = vpop.f32.mrb[45].mxu1  ;;  %v1790_v40 = vpop.f32.mrb[46].mxu0 }
 0x294   :  { %v1853_v15 = vadd.f32 %v1852_v45, %v1851_v57  ;;  %v1854_v58 = vpop.f32.mrb[46].mxu1  ;;  %v1791_v9 = vpop.f32.mrb[47].mxu0 }
 0x295   :  { %v1792_v18 = vadd.f32 %v1791_v9, %v1790_v40  ;;  %v1855_v38 = vpop.f32.mrb[47].mxu1  ;;  %v1635_v40 = vld [vmem:[#allocation5 + $0x68] sm:$0xff] }
 0x296   :  { %v1533_v48 = vadd.f32 %v1853_v15, %v1789_v4  ;;  %v1856_v6 = vadd.f32 %v1855_v38, %v1854_v58  ;;  %v1634_v4 = vld [vmem:[#allocation5 + $0x60] sm:$0xff] }
 0x298   :  { %v1536_v27 = vadd.f32 %v1856_v6, %v1792_v18  ;;  %v1644_v10 = vmul.f32 %v1628_v56, %v1533_v48 }
 0x29a   :  { %1660 = vst [vmem:[#allocation10 + $0x30] sm:$0xff] %v1644_v10  ;;  %v1645_v32 = vmul.f32 %v1629_v31, %v1536_v27 }
 0x29c   :  { %1661 = vst [vmem:[#allocation10 + $0x38] sm:$0xff] %v1645_v32 }
 0x2a1   :  { %v1793_v23 = vpop.f32.mrb[48].mxu0 }
 0x2a2   :  { %v1857_v30 = vpop.f32.mrb[48].mxu1  ;;  %v1794_v3 = vpop.f32.mrb[49].mxu0 }
 0x2a3   :  { %v1795_v61 = vadd.f32 %v1794_v3, %v1793_v23  ;;  %v1858_v25 = vpop.f32.mrb[49].mxu1  ;;  %v1796_v1 = vpop.f32.mrb[50].mxu0 }
 0x2a4   :  { %v1859_v53 = vadd.f32 %v1858_v25, %v1857_v30  ;;  %v1860_v20 = vpop.f32.mrb[50].mxu1  ;;  %v1797_v22 = vpop.f32.mrb[51].mxu0 }
 0x2a5   :  { %v1798_v52 = vadd.f32 %v1797_v22, %v1796_v1  ;;  %v1861_v0 = vpop.f32.mrb[51].mxu1  ;;  %v1637_v1 = vld [vmem:[#allocation5 + $0x78] sm:$0xff] }
 0x2a6   :  { %v1541_v51 = vadd.f32 %v1859_v53, %v1795_v61  ;;  %v1862_v16 = vadd.f32 %v1861_v0, %v1860_v20  ;;  %v1636_v61 = vld [vmem:[#allocation5 + $0x70] sm:$0xff] }
 0x2a8   :  { %v1544_v54 = vadd.f32 %v1862_v16, %v1798_v52  ;;  %v1646_v29 = vmul.f32 %v1630_v34, %v1541_v51 }
 0x2a9   :  { %v1799_v13 = vpop.f32.mrb[52].mxu0 }
 0x2aa   :  { %v1863_v63 = vpop.f32.mrb[52].mxu1  ;;  %v1800_v24 = vpop.f32.mrb[53].mxu0  ;;  %1662 = vst [vmem:[#allocation10 + $0x40] sm:$0xff] %v1646_v29  ;;  %v1647_v46 = vmul.f32 %v1631_v17, %v1544_v54 }
 0x2ab   :  { %v1801_v19 = vadd.f32 %v1800_v24, %v1799_v13  ;;  %v1864_v36 = vpop.f32.mrb[53].mxu1  ;;  %v1802_v8 = vpop.f32.mrb[54].mxu0 }
 0x2ac   :  { %v1865_v37 = vadd.f32 %v1864_v36, %v1863_v63  ;;  %v1866_v33 = vpop.f32.mrb[54].mxu1  ;;  %v1803_v21 = vpop.f32.mrb[55].mxu0  ;;  %1663 = vst [vmem:[#allocation10 + $0x48] sm:$0xff] %v1647_v46 }
 0x2ad   :  { %v1804_v26 = vadd.f32 %v1803_v21, %v1802_v8  ;;  %v1867_v11 = vpop.f32.mrb[55].mxu1 }
 0x2ae   :  { %v1549_v62 = vadd.f32 %v1865_v37, %v1801_v19  ;;  %v1868_v41 = vadd.f32 %v1867_v11, %v1866_v33 }
 0x2b0   :  { %v1552_v35 = vadd.f32 %v1868_v41, %v1804_v26  ;;  %v1648_v55 = vmul.f32 %v1632_v12, %v1549_v62 }
 0x2b1   :  { %v1805_v42 = vpop.f32.mrb[56].mxu0 }
 0x2b2   :  { %v1869_v2 = vpop.f32.mrb[56].mxu1  ;;  %v1806_v43 = vpop.f32.mrb[57].mxu0  ;;  %1664 = vst [vmem:[#allocation10 + $0x50] sm:$0xff] %v1648_v55  ;;  %v1649_v28 = vmul.f32 %v1633_v44, %v1552_v35 }
 0x2b3   :  { %v1807_v47 = vadd.f32 %v1806_v43, %v1805_v42  ;;  %v1870_v50 = vpop.f32.mrb[57].mxu1  ;;  %v1808_v5 = vpop.f32.mrb[58].mxu0 }
 0x2b4   :  { %v1871_v59 = vadd.f32 %v1870_v50, %v1869_v2  ;;  %v1872_v39 = vpop.f32.mrb[58].mxu1  ;;  %v1809_v14 = vpop.f32.mrb[59].mxu0  ;;  %1665 = vst [vmem:[#allocation10 + $0x58] sm:$0xff] %v1649_v28 }
 0x2b5   :  { %v1810_v60 = vadd.f32 %v1809_v14, %v1808_v5  ;;  %v1873_v49 = vpop.f32.mrb[59].mxu1 }
 0x2b6   :  { %v1557_v57 = vadd.f32 %v1871_v59, %v1807_v47  ;;  %v1874_v7 = vadd.f32 %v1873_v49, %v1872_v39 }
 0x2b8   :  { %v1560_v45 = vadd.f32 %v1874_v7, %v1810_v60  ;;  %v1650_v58 = vmul.f32 %v1634_v4, %v1557_v57 }
 0x2b9   :  { %v1811_v15 = vpop.f32.mrb[60].mxu0 }
 0x2ba   :  { %v1875_v9 = vpop.f32.mrb[60].mxu1  ;;  %v1812_v18 = vpop.f32.mrb[61].mxu0  ;;  %1666 = vst [vmem:[#allocation10 + $0x60] sm:$0xff] %v1650_v58  ;;  %v1651_v56 = vmul.f32 %v1635_v40, %v1560_v45 }
 0x2bb   :  { %v1813_v38 = vadd.f32 %v1812_v18, %v1811_v15  ;;  %v1876_v48 = vpop.f32.mrb[61].mxu1  ;;  %v1814_v6 = vpop.f32.mrb[62].mxu0 }
 0x2bc   :  { %v1877_v27 = vadd.f32 %v1876_v48, %v1875_v9  ;;  %v1878_v31 = vpop.f32.mrb[62].mxu1  ;;  %v1815_v10 = vpop.f32.mrb[63].mxu0  ;;  %1667 = vst [vmem:[#allocation10 + $0x68] sm:$0xff] %v1651_v56 }
 0x2bd   :  { %v1816_v32 = vadd.f32 %v1815_v10, %v1814_v6  ;;  %v1879_v23 = vpop.f32.mrb[63].mxu1 }
 0x2be   :  { %v1565_v30 = vadd.f32 %v1877_v27, %v1813_v38  ;;  %v1880_v3 = vadd.f32 %v1879_v23, %v1878_v31 }
 0x2c0   :  { %v1568_v25 = vadd.f32 %v1880_v3, %v1816_v32  ;;  %v1652_v53 = vmul.f32 %v1636_v61, %v1565_v30 }
 0x2c2   :  { %1668 = vst [vmem:[#allocation10 + $0x70] sm:$0xff] %v1652_v53  ;;  %v1653_v20 = vmul.f32 %v1637_v1, %v1568_v25 }
 0x2c4   :  { %1669 = vst [vmem:[#allocation10 + $0x78] sm:$0xff] %v1653_v20 }
 0x2c5   :  { %2201 = shalt.err (!%p2198_p8)
}
 0x2c6   :  { %s2202_s26 = scalar_lea.hbm %s2956_s5, 2048 }
 0x2c7   :  { %p2203_p9 = scmp.ne.s32.totalorder %s2956_s5, %s2202_s26  ;;  %p2206_p10 = scmp.lt.u32.totalorder %s2202_s26, %s2956_s5 }
 0x2c9   :  { %p2208_p11 = pnand %p2206_p10, %p2203_p9 }
 0x2cb   :  { %2211 = shalt.err (!%p2208_p11)
}
 0x2cc   :  { %1681 = dma.vmem_to_hbm [thread:$0]  %s1676_s22, 2048, %s2956_s5, [#allocation4], %s2222_s30, %s2222_s30, %s2223_s6  }
 0x2cd   :  { %2218 = dma.done.wait [#allocation4], 2048  }
 0x2ce   :  { %2219 = vsyncadd [#allocation4], 4294965248 }
 0x2cf   :  { %1685 = vsyncpa [#allocation3], 1 }
 0x2d0   :  { %1686 = vsyncpa [#allocation6], 1 }
 0x2d1   :  { %1687 = vsyncpa [#allocation9], 1 }
 0x2d2   :  { %1688 = vsyncpa [#allocation4], 1 }

</bundles_post_ra>
